<compile_context>
chip_gen: v6e
topology: v6e:2x2x1
jax: 0.10.0
libtpu: 0.0.40
codegen_flags: <defaults>
</compile_context>

<pallas_src>
import functools

import jax
import jax.numpy as jnp
from jax import lax
from jax.experimental import pallas as pl
from jax.experimental.pallas import tpu as pltpu

EPS = 1e-5               # nn.BatchNorm2d default eps
C_PAD = 128              # lane width; also the full MXU output width on v5e
MXU_DTYPE = jnp.bfloat16  # MXU operand dtype (accumulation stays f32)


# --------------------------- in-kernel helpers -----------------------------------------------------

def _zero_pad_into(xp_ref, x_hw, H, W):
    """Write x_hw (H, W, C) into the interior of the (H+2, W+2, C) VMEM scratch; zero the halo."""
    xp_ref[...] = jnp.zeros(xp_ref.shape, xp_ref.dtype)
    xp_ref[pl.ds(1, H), pl.ds(1, W), :] = x_hw.astype(xp_ref.dtype)


def _im2col_matmul(xp_ref, col_ref, w_ref, H, W, Cin):
    """3x3 conv (stride 1, pad 1) as a single (H*W, 9*Cin) x (9*Cin, Cout_pad) MXU matmul."""
    for t in range(9):
        dy, dx = divmod(t, 3)
        patch = xp_ref[pl.ds(dy, H), pl.ds(dx, W), :]                      # (H, W, Cin) f32
        col_ref[:, pl.ds(t * Cin, Cin)] = patch.reshape(H * W, Cin).astype(col_ref.dtype)
    return jnp.dot(col_ref[...], w_ref[...], preferred_element_type=jnp.float32)


def _store_stats(st_ref, acc):
    """Per-grid-step partial sum / sum-of-squares (reduced across N in the wrapper)."""
    st_ref[0, pl.ds(0, 1), :] = jnp.sum(acc, axis=0, keepdims=True)
    st_ref[0, pl.ds(1, 1), :] = jnp.sum(acc * acc, axis=0, keepdims=True)


# --------------------------- kernel A: conv1 + BN1 partial stats -----------------------------------

def _conv1_stats_kernel(x_ref, w_ref, y_ref, st_ref, xp_ref, col_ref, *, H, W, Cin):
    _zero_pad_into(xp_ref, x_ref[0].reshape(H, W, Cin), H, W)
    acc = _im2col_matmul(xp_ref, col_ref, w_ref, H, W, Cin)                # (H*W, C_PAD) f32
    y_ref[0] = acc
    _store_stats(st_ref, acc)


# --------------------------- kernel B: BN1+ReLU prologue, conv2 + BN2 partial stats ----------------

def _bnrelu_conv2_stats_kernel(y1_ref, sc_ref, bi_ref, w_ref, y_ref, st_ref, xp_ref, col_ref,
                               *, H, W, Cp):
    a = jnp.maximum(y1_ref[0] * sc_ref[...] + bi_ref[...], 0.0)            # BN1 + ReLU, f32
    _zero_pad_into(xp_ref, a.reshape(H, W, Cp), H, W)
    acc = _im2col_matmul(xp_ref, col_ref, w_ref, H, W, Cp)                 # (H*W, C_PAD) f32
    y_ref[0] = acc
    _store_stats(st_ref, acc)


# --------------------------- kernel C: BN2 + residual add + ReLU -----------------------------------

def _bn2_add_relu_kernel(y2_ref, res_ref, sc_ref, bi_ref, o_ref, *, Cin):
    y = (y2_ref[0, :, pl.ds(0, Cin)] * sc_ref[:, pl.ds(0, Cin)]
         + bi_ref[:, pl.ds(0, Cin)] + res_ref[0])
    o_ref[0] = jnp.maximum(y, 0.0).astype(o_ref.dtype)


# --------------------------- wrapper-side folding helpers ------------------------------------------

def _fold_conv_weight(w_oihw, cin_pad, cout_pad):
    """PyTorch OIHW conv weight -> zero-padded (9*cin_pad, cout_pad) bf16 im2col weight matrix."""
    co, ci, kh, kw = w_oihw.shape
    w = jnp.transpose(w_oihw, (2, 3, 1, 0))                                # HWIO (kh, kw, ci, co)
    w = jnp.pad(w, ((0, 0), (0, 0), (0, cin_pad - ci), (0, cout_pad - co)))
    return w.reshape(kh * kw * cin_pad, cout_pad).astype(MXU_DTYPE)


def _bn_fold(stats, gamma, beta, count):
    """Training-mode BN folded into per-channel (1, C_PAD) scale/bias (biased variance)."""
    c_pad = stats.shape[-1]
    g = jnp.pad(gamma, (0, c_pad - gamma.shape[0]))                        # padded chans: scale=bias=0
    b = jnp.pad(beta, (0, c_pad - beta.shape[0]))
    s = jnp.sum(stats, axis=0)                                             # (2, c_pad) f32
    mean = s[0] / count
    # One-pass E[x^2]-E[x]^2 over the f32 MXU accumulator; conv outputs are ~zero-mean here so
    # cancellation is mild; the clamp guards tiny negatives.  (A two-pass variance would need an
    # extra full-tensor read.)
    var = jnp.maximum(s[1] / count - mean * mean, 0.0)
    scale = g * lax.rsqrt(var + EPS)
    bias = b - mean * scale
    return scale.reshape(1, c_pad), bias.reshape(1, c_pad)


# --------------------------- BasicBlock forward ----------------------------------------------------

def basic_block_forward(x_nchw, params):
    N, Cin, H, W = x_nchw.shape
    Cp, HW = C_PAD, H * W
    cparams = pltpu.CompilerParams(dimension_semantics=("parallel",),
                                   vmem_limit_bytes=32 * 1024 * 1024)

    # channels-last, spatially-flattened activations (tiny boundary transpose; see TODO above).
    x = jnp.transpose(x_nchw, (0, 2, 3, 1)).reshape(N, HW, Cin)

    w1 = _fold_conv_weight(params["conv1_w"], Cin, Cp)                     # (9*Cin, Cp) bf16
    w2 = _fold_conv_weight(params["conv2_w"], Cp, Cp)                      # (9*Cp,  Cp) bf16

    # ---- kernel A: conv1 + BN1 partial stats -------------------------------------------------
    y1, st1 = pl.pallas_call(
        functools.partial(_conv1_stats_kernel, H=H, W=W, Cin=Cin),
        out_shape=(jax.ShapeDtypeStruct((N, HW, Cp), jnp.float32),
                   jax.ShapeDtypeStruct((N, 2, Cp), jnp.float32)),
        grid=(N,),
        in_specs=[pl.BlockSpec((1, HW, Cin), lambda n: (n, 0, 0)),
                  pl.BlockSpec((9 * Cin, Cp), lambda n: (0, 0))],
        out_specs=(pl.BlockSpec((1, HW, Cp), lambda n: (n, 0, 0)),
                   pl.BlockSpec((1, 2, Cp), lambda n: (n, 0, 0))),
        scratch_shapes=[pltpu.VMEM((H + 2, W + 2, Cin), jnp.float32),
                        pltpu.VMEM((HW, 9 * Cin), MXU_DTYPE)],
        compiler_params=cparams,
    )(x, w1)
    scale1, bias1 = _bn_fold(st1, params["bn1_gamma"], params["bn1_beta"], float(N * HW))

    # ---- kernel B: BN1+ReLU prologue, conv2 + BN2 partial stats -------------------------------
    y2, st2 = pl.pallas_call(
        functools.partial(_bnrelu_conv2_stats_kernel, H=H, W=W, Cp=Cp),
        out_shape=(jax.ShapeDtypeStruct((N, HW, Cp), jnp.float32),
                   jax.ShapeDtypeStruct((N, 2, Cp), jnp.float32)),
        grid=(N,),
        in_specs=[pl.BlockSpec((1, HW, Cp), lambda n: (n, 0, 0)),
                  pl.BlockSpec((1, Cp), lambda n: (0, 0)),
                  pl.BlockSpec((1, Cp), lambda n: (0, 0)),
                  pl.BlockSpec((9 * Cp, Cp), lambda n: (0, 0))],
        out_specs=(pl.BlockSpec((1, HW, Cp), lambda n: (n, 0, 0)),
                   pl.BlockSpec((1, 2, Cp), lambda n: (n, 0, 0))),
        scratch_shapes=[pltpu.VMEM((H + 2, W + 2, Cp), jnp.float32),
                        pltpu.VMEM((HW, 9 * Cp), MXU_DTYPE)],
        compiler_params=cparams,
    )(y1, scale1, bias1, w2)
    scale2, bias2 = _bn_fold(st2, params["bn2_gamma"], params["bn2_beta"], float(N * HW))

    # ---- kernel C: BN2 + residual add + ReLU ---------------------------------------------------
    out = pl.pallas_call(
        functools.partial(_bn2_add_relu_kernel, Cin=Cin),
        out_shape=jax.ShapeDtypeStruct((N, HW, Cin), jnp.float32),
        grid=(N,),
        in_specs=[pl.BlockSpec((1, HW, Cp), lambda n: (n, 0, 0)),
                  pl.BlockSpec((1, HW, Cin), lambda n: (n, 0, 0)),
                  pl.BlockSpec((1, Cp), lambda n: (0, 0)),
                  pl.BlockSpec((1, Cp), lambda n: (0, 0))],
        out_specs=pl.BlockSpec((1, HW, Cin), lambda n: (n, 0, 0)),
        compiler_params=cparams,
    )(y2, x, scale2, bias2)

    return jnp.transpose(out.reshape(N, H, W, Cin), (0, 3, 1, 2))          # NHWC -> NCHW


# --------------------------- pure-JAX reference (for correctness check) ----------------------------

def basic_block_ref(x_nchw, params, mxu_dtype=MXU_DTYPE):
    x = jnp.transpose(x_nchw, (0, 2, 3, 1))
    w1 = jnp.transpose(params["conv1_w"], (2, 3, 1, 0))
    w2 = jnp.transpose(params["conv2_w"], (2, 3, 1, 0))

    def conv(y, w):
        # mirror the kernel's precision choice: MXU operands in `mxu_dtype`, f32 accumulation.
        return lax.conv_general_dilated(
            y.astype(mxu_dtype), w.astype(mxu_dtype),
            window_strides=(1, 1), padding=((1, 1), (1, 1)),
            dimension_numbers=("NHWC", "HWIO", "NHWC"),
            preferred_element_type=jnp.float32)

    def bn(y, g, b):
        m = jnp.mean(y, axis=(0, 1, 2))
        v = jnp.mean(jnp.square(y - m), axis=(0, 1, 2))
        return (y - m) * lax.rsqrt(v + EPS) * g + b

    out = jax.nn.relu(bn(conv(x, w1), params["bn1_gamma"], params["bn1_beta"]))
    out = bn(conv(out, w2), params["bn2_gamma"], params["bn2_beta"])
    out = jax.nn.relu(out + x)
    return jnp.transpose(out, (0, 3, 1, 2))


if __name__ == "__main__":
    N, C, H, W = 2, 4, 16, 16          # inplanes = planes = 4 (BasicBlock.expansion == 1)
    planes = 4

    key = jax.random.PRNGKey(0)
    kx, k1, k2 = jax.random.split(key, 3)
    x = jax.random.normal(kx, (N, C, H, W), jnp.float32)

    params = {
        # PyTorch Conv2d weight layout (out, in, kh, kw), deterministic init.
        "conv1_w": jax.random.normal(k1, (planes, C, 3, 3), jnp.float32) / (3.0 * (C ** 0.5)),
        "conv2_w": jax.random.normal(k2, (planes, planes, 3, 3), jnp.float32) / (3.0 * (planes ** 0.5)),
        # nn.BatchNorm2d(affine=True) default init: gamma=1, beta=0.
        "bn1_gamma": jnp.ones((planes,), jnp.float32),
        "bn1_beta": jnp.zeros((planes,), jnp.float32),
        "bn2_gamma": jnp.ones((planes,), jnp.float32),
        "bn2_beta": jnp.zeros((planes,), jnp.float32),
    }

    out = jax.block_until_ready(basic_block_forward(x, params))
    assert out.shape == (N, planes, H, W), out.shape

    # Tight check vs. a reference that mirrors the kernel's precision (bf16 MXU operands, f32 accum).
    ref_bf16 = jax.block_until_ready(basic_block_ref(x, params, mxu_dtype=MXU_DTYPE))
    assert float(jnp.max(jnp.abs(out - ref_bf16))) < 1e-2, "mismatch vs bf16-MXU reference"

    # Loose sanity check vs. an all-f32 reference (bounds the bf16 rounding of the MXU operands).
    ref_f32 = jax.block_until_ready(basic_block_ref(x, params, mxu_dtype=jnp.float32))
    assert float(jnp.max(jnp.abs(out - ref_f32))) < 1.5e-1, "mismatch vs f32 reference"

    print("KERNEL_OK")
</pallas_src>

<mosaic_0001>
module attributes {stable_mosaic.version = 11 : i64} {
  func.func @_conv1_stats_kernel(%arg0: i32, %arg1: memref<1x256x4xf32, #tpu.memory_space<vmem>>, %arg2: memref<36x128xbf16, #tpu.memory_space<vmem>>, %arg3: memref<1x256x128xf32, #tpu.memory_space<vmem>>, %arg4: memref<1x2x128xf32, #tpu.memory_space<vmem>>, %arg5: memref<18x18x4xf32, #tpu.memory_space<vmem>>, %arg6: memref<256x36xbf16, #tpu.memory_space<vmem>>) attributes {dimension_semantics = [#tpu.dimension_semantics<parallel>], iteration_bounds = array<i64: 2>, scalar_prefetch = 0 : i64, scratch_operands = 2 : i64, tpu.core_type = #tpu.core_type<tc>, window_params = [{transform_indices = @transform_0, window_bounds = array<i64: 1, 256, 4>}, {pipeline_mode = #tpu.pipeline_mode<synchronous>, transform_indices = @transform_1, window_bounds = array<i64: 36, 128>}, {transform_indices = @transform_2, window_bounds = array<i64: 1, 256, 128>}, {transform_indices = @transform_3, window_bounds = array<i64: 1, 2, 128>}]} {
    %c0 = arith.constant 0 : index
    %c0_0 = arith.constant 0 : index
    %c0_1 = arith.constant 0 : index
    %0 = vector.load %arg1[%c0, %c0_0, %c0_1] : memref<1x256x4xf32, #tpu.memory_space<vmem>>, vector<1x256x4xf32>
    %1 = vector.shape_cast %0 : vector<1x256x4xf32> to vector<256x4xf32>
    %2 = vector.shape_cast %1 : vector<256x4xf32> to vector<16x16x4xf32>
    %cst = arith.constant 0.000000e+00 : f32
    %3 = vector.broadcast %cst : f32 to vector<18x18x4xf32>
    %c0_2 = arith.constant 0 : index
    %c0_3 = arith.constant 0 : index
    %c0_4 = arith.constant 0 : index
    %4 = vector.load %arg5[%c0_2, %c0_3, %c0_4] : memref<18x18x4xf32, #tpu.memory_space<vmem>>, vector<18x18x4xf32>
    tpu.vector_store %arg5[%c0_2, %c0_3, %c0_4], %3 {strides = array<i32>} : memref<18x18x4xf32, #tpu.memory_space<vmem>>, vector<18x18x4xf32>,
    %c1 = arith.constant 1 : index
    %c1_5 = arith.constant 1 : index
    %c0_6 = arith.constant 0 : index
    %5 = vector.load %arg5[%c1, %c1_5, %c0_6] : memref<18x18x4xf32, #tpu.memory_space<vmem>>, vector<16x16x4xf32>
    tpu.vector_store %arg5[%c1, %c1_5, %c0_6], %2 {strides = array<i32>} : memref<18x18x4xf32, #tpu.memory_space<vmem>>, vector<16x16x4xf32>,
    %c0_7 = arith.constant 0 : index
    %c0_8 = arith.constant 0 : index
    %c0_9 = arith.constant 0 : index
    %6 = vector.load %arg5[%c0_7, %c0_8, %c0_9] : memref<18x18x4xf32, #tpu.memory_space<vmem>>, vector<16x16x4xf32>
    %7 = vector.shape_cast %6 : vector<16x16x4xf32> to vector<256x4xf32>
    %8 = arith.truncf %7 : vector<256x4xf32> to vector<256x4xbf16>
    %c0_10 = arith.constant 0 : index
    %c0_11 = arith.constant 0 : index
    %9 = vector.load %arg6[%c0_10, %c0_11] : memref<256x36xbf16, #tpu.memory_space<vmem>>, vector<256x4xbf16>
    tpu.vector_store %arg6[%c0_10, %c0_11], %8 {strides = array<i32>} : memref<256x36xbf16, #tpu.memory_space<vmem>>, vector<256x4xbf16>,
    %c0_12 = arith.constant 0 : index
    %c1_13 = arith.constant 1 : index
    %c0_14 = arith.constant 0 : index
    %10 = vector.load %arg5[%c0_12, %c1_13, %c0_14] : memref<18x18x4xf32, #tpu.memory_space<vmem>>, vector<16x16x4xf32>
    %11 = vector.shape_cast %10 : vector<16x16x4xf32> to vector<256x4xf32>
    %12 = arith.truncf %11 : vector<256x4xf32> to vector<256x4xbf16>
    %c0_15 = arith.constant 0 : index
    %c4 = arith.constant 4 : index
    %13 = vector.load %arg6[%c0_15, %c4] : memref<256x36xbf16, #tpu.memory_space<vmem>>, vector<256x4xbf16>
    tpu.vector_store %arg6[%c0_15, %c4], %12 {strides = array<i32>} : memref<256x36xbf16, #tpu.memory_space<vmem>>, vector<256x4xbf16>,
    %c0_16 = arith.constant 0 : index
    %c2 = arith.constant 2 : index
    %c0_17 = arith.constant 0 : index
    %14 = vector.load %arg5[%c0_16, %c2, %c0_17] : memref<18x18x4xf32, #tpu.memory_space<vmem>>, vector<16x16x4xf32>
    %15 = vector.shape_cast %14 : vector<16x16x4xf32> to vector<256x4xf32>
    %16 = arith.truncf %15 : vector<256x4xf32> to vector<256x4xbf16>
    %c0_18 = arith.constant 0 : index
    %c8 = arith.constant 8 : index
    %17 = vector.load %arg6[%c0_18, %c8] : memref<256x36xbf16, #tpu.memory_space<vmem>>, vector<256x4xbf16>
    tpu.vector_store %arg6[%c0_18, %c8], %16 {strides = array<i32>} : memref<256x36xbf16, #tpu.memory_space<vmem>>, vector<256x4xbf16>,
    %c1_19 = arith.constant 1 : index
    %c0_20 = arith.constant 0 : index
    %c0_21 = arith.constant 0 : index
    %18 = vector.load %arg5[%c1_19, %c0_20, %c0_21] : memref<18x18x4xf32, #tpu.memory_space<vmem>>, vector<16x16x4xf32>
    %19 = vector.shape_cast %18 : vector<16x16x4xf32> to vector<256x4xf32>
    %20 = arith.truncf %19 : vector<256x4xf32> to vector<256x4xbf16>
    %c0_22 = arith.constant 0 : index
    %c12 = arith.constant 12 : index
    %21 = vector.load %arg6[%c0_22, %c12] : memref<256x36xbf16, #tpu.memory_space<vmem>>, vector<256x4xbf16>
    tpu.vector_store %arg6[%c0_22, %c12], %20 {strides = array<i32>} : memref<256x36xbf16, #tpu.memory_space<vmem>>, vector<256x4xbf16>,
    %c1_23 = arith.constant 1 : index
    %c1_24 = arith.constant 1 : index
    %c0_25 = arith.constant 0 : index
    %22 = vector.load %arg5[%c1_23, %c1_24, %c0_25] : memref<18x18x4xf32, #tpu.memory_space<vmem>>, vector<16x16x4xf32>
    %23 = vector.shape_cast %22 : vector<16x16x4xf32> to vector<256x4xf32>
    %24 = arith.truncf %23 : vector<256x4xf32> to vector<256x4xbf16>
    %c0_26 = arith.constant 0 : index
    %c16 = arith.constant 16 : index
    %25 = vector.load %arg6[%c0_26, %c16] : memref<256x36xbf16, #tpu.memory_space<vmem>>, vector<256x4xbf16>
    tpu.vector_store %arg6[%c0_26, %c16], %24 {strides = array<i32>} : memref<256x36xbf16, #tpu.memory_space<vmem>>, vector<256x4xbf16>,
    %c1_27 = arith.constant 1 : index
    %c2_28 = arith.constant 2 : index
    %c0_29 = arith.constant 0 : index
    %26 = vector.load %arg5[%c1_27, %c2_28, %c0_29] : memref<18x18x4xf32, #tpu.memory_space<vmem>>, vector<16x16x4xf32>
    %27 = vector.shape_cast %26 : vector<16x16x4xf32> to vector<256x4xf32>
    %28 = arith.truncf %27 : vector<256x4xf32> to vector<256x4xbf16>
    %c0_30 = arith.constant 0 : index
    %c20 = arith.constant 20 : index
    %29 = vector.load %arg6[%c0_30, %c20] : memref<256x36xbf16, #tpu.memory_space<vmem>>, vector<256x4xbf16>
    tpu.vector_store %arg6[%c0_30, %c20], %28 {strides = array<i32>} : memref<256x36xbf16, #tpu.memory_space<vmem>>, vector<256x4xbf16>,
    %c2_31 = arith.constant 2 : index
    %c0_32 = arith.constant 0 : index
    %c0_33 = arith.constant 0 : index
    %30 = vector.load %arg5[%c2_31, %c0_32, %c0_33] : memref<18x18x4xf32, #tpu.memory_space<vmem>>, vector<16x16x4xf32>
    %31 = vector.shape_cast %30 : vector<16x16x4xf32> to vector<256x4xf32>
    %32 = arith.truncf %31 : vector<256x4xf32> to vector<256x4xbf16>
    %c0_34 = arith.constant 0 : index
    %c24 = arith.constant 24 : index
    %33 = vector.load %arg6[%c0_34, %c24] : memref<256x36xbf16, #tpu.memory_space<vmem>>, vector<256x4xbf16>
    tpu.vector_store %arg6[%c0_34, %c24], %32 {strides = array<i32>} : memref<256x36xbf16, #tpu.memory_space<vmem>>, vector<256x4xbf16>,
    %c2_35 = arith.constant 2 : index
    %c1_36 = arith.constant 1 : index
    %c0_37 = arith.constant 0 : index
    %34 = vector.load %arg5[%c2_35, %c1_36, %c0_37] : memref<18x18x4xf32, #tpu.memory_space<vmem>>, vector<16x16x4xf32>
    %35 = vector.shape_cast %34 : vector<16x16x4xf32> to vector<256x4xf32>
    %36 = arith.truncf %35 : vector<256x4xf32> to vector<256x4xbf16>
    %c0_38 = arith.constant 0 : index
    %c28 = arith.constant 28 : index
    %37 = vector.load %arg6[%c0_38, %c28] : memref<256x36xbf16, #tpu.memory_space<vmem>>, vector<256x4xbf16>
    tpu.vector_store %arg6[%c0_38, %c28], %36 {strides = array<i32>} : memref<256x36xbf16, #tpu.memory_space<vmem>>, vector<256x4xbf16>,
    %c2_39 = arith.constant 2 : index
    %c2_40 = arith.constant 2 : index
    %c0_41 = arith.constant 0 : index
    %38 = vector.load %arg5[%c2_39, %c2_40, %c0_41] : memref<18x18x4xf32, #tpu.memory_space<vmem>>, vector<16x16x4xf32>
    %39 = vector.shape_cast %38 : vector<16x16x4xf32> to vector<256x4xf32>
    %40 = arith.truncf %39 : vector<256x4xf32> to vector<256x4xbf16>
    %c0_42 = arith.constant 0 : index
    %c32 = arith.constant 32 : index
    %41 = vector.load %arg6[%c0_42, %c32] : memref<256x36xbf16, #tpu.memory_space<vmem>>, vector<256x4xbf16>
    tpu.vector_store %arg6[%c0_42, %c32], %40 {strides = array<i32>} : memref<256x36xbf16, #tpu.memory_space<vmem>>, vector<256x4xbf16>,
    %c0_43 = arith.constant 0 : index
    %c0_44 = arith.constant 0 : index
    %42 = vector.load %arg6[%c0_43, %c0_44] : memref<256x36xbf16, #tpu.memory_space<vmem>>, vector<256x36xbf16>
    %c0_45 = arith.constant 0 : index
    %c0_46 = arith.constant 0 : index
    %43 = vector.load %arg2[%c0_45, %c0_46] : memref<36x128xbf16, #tpu.memory_space<vmem>>, vector<36x128xbf16>
    %cst_47 = arith.constant dense<0.000000e+00> : vector<256x128xf32>
    %44 = tpu.matmul %42, %43, %cst_47 {dimension_numbers = #tpu.dot_dimension_numbers<[1], [0], [0], [1], [0, 0, 1, 1], [], []>} : vector<256x36xbf16>, vector<36x128xbf16>, vector<256x128xf32> -> vector<256x128xf32>
    %c0_48 = arith.constant 0 : index
    %c0_49 = arith.constant 0 : index
    %c0_50 = arith.constant 0 : index
    %45 = vector.load %arg3[%c0_48, %c0_49, %c0_50] : memref<1x256x128xf32, #tpu.memory_space<vmem>>, vector<1x256x128xf32>
    %46 = vector.shape_cast %45 : vector<1x256x128xf32> to vector<256x128xf32>
    %47 = vector.shape_cast %44 : vector<256x128xf32> to vector<1x256x128xf32>
    tpu.vector_store %arg3[%c0_48, %c0_49, %c0_50], %47 {strides = array<i32>} : memref<1x256x128xf32, #tpu.memory_space<vmem>>, vector<1x256x128xf32>,
    %cst_51 = arith.constant dense<0.000000e+00> : vector<128xf32>
    %48 = vector.multi_reduction <add>, %44, %cst_51 [0] : vector<256x128xf32> to vector<128xf32>
    %49 = vector.shape_cast %48 : vector<128xf32> to vector<1x128xf32>
    %c0_52 = arith.constant 0 : index
    %c0_53 = arith.constant 0 : index
    %c0_54 = arith.constant 0 : index
    %50 = vector.load %arg4[%c0_52, %c0_53, %c0_54] : memref<1x2x128xf32, #tpu.memory_space<vmem>>, vector<1x1x128xf32>
    %51 = vector.shape_cast %50 : vector<1x1x128xf32> to vector<1x128xf32>
    %52 = vector.shape_cast %49 : vector<1x128xf32> to vector<1x1x128xf32>
    tpu.vector_store %arg4[%c0_52, %c0_53, %c0_54], %52 {strides = array<i32>} : memref<1x2x128xf32, #tpu.memory_space<vmem>>, vector<1x1x128xf32>,
    %53 = arith.mulf %44, %44 : vector<256x128xf32>
    %cst_55 = arith.constant dense<0.000000e+00> : vector<128xf32>
    %54 = vector.multi_reduction <add>, %53, %cst_55 [0] : vector<256x128xf32> to vector<128xf32>
    %55 = vector.shape_cast %54 : vector<128xf32> to vector<1x128xf32>
    %c0_56 = arith.constant 0 : index
    %c1_57 = arith.constant 1 : index
    %c0_58 = arith.constant 0 : index
    %56 = vector.load %arg4[%c0_56, %c1_57, %c0_58] : memref<1x2x128xf32, #tpu.memory_space<vmem>>, vector<1x1x128xf32>
    %57 = vector.shape_cast %56 : vector<1x1x128xf32> to vector<1x128xf32>
    %58 = vector.shape_cast %55 : vector<1x128xf32> to vector<1x1x128xf32>
    tpu.vector_store %arg4[%c0_56, %c1_57, %c0_58], %58 {strides = array<i32>} : memref<1x2x128xf32, #tpu.memory_space<vmem>>, vector<1x1x128xf32>,
    return
  }
  func.func @transform_0(%arg0: i32) -> (i32, i32, i32) {
    %c0_i32 = arith.constant 0 : i32
    %c0_i32_0 = arith.constant 0 : i32
    %c0_i32_1 = arith.constant 0 : i32
    return %arg0, %c0_i32, %c0_i32_0 : i32, i32, i32
  }
  func.func @transform_1(%arg0: i32) -> (i32, i32) {
    %c0_i32 = arith.constant 0 : i32
    %c0_i32_0 = arith.constant 0 : i32
    %c0_i32_1 = arith.constant 0 : i32
    return %c0_i32, %c0_i32_0 : i32, i32
  }
  func.func @transform_2(%arg0: i32) -> (i32, i32, i32) {
    %c0_i32 = arith.constant 0 : i32
    %c0_i32_0 = arith.constant 0 : i32
    %c0_i32_1 = arith.constant 0 : i32
    return %arg0, %c0_i32, %c0_i32_0 : i32, i32, i32
  }
  func.func @transform_3(%arg0: i32) -> (i32, i32, i32) {
    %c0_i32 = arith.constant 0 : i32
    %c0_i32_0 = arith.constant 0 : i32
    %c0_i32_1 = arith.constant 0 : i32
    return %arg0, %c0_i32, %c0_i32_0 : i32, i32, i32
  }
}

</mosaic_0001>

<bundles_post_ra>
// kernel: tpu_custom_call.1
= control target key start
LH: loop header
LB: loop body
LE: loop exit
PB: predicated region body
PF: predicated region fallthrough
CT: control target
= control target key end

     0   :  { %9 = vsyncpa [#allocation5], 0  ;;  %s5090_s0 = inlined_call_operand.vmem [shape: f32[2,256,4], index: 0, kind: input, shape index: {}]   ;;  %s5091_s1 = inlined_call_operand.vmem [shape: bf16[36,128], index: 1, kind: input, shape index: {}]   ;;  %s5092_s2 = inlined_call_operand.hbm [shape: f32[2,256,128], index: 2, kind: output, shape index: {0}]   ;;  %s5093_s3 = inlined_call_operand.hbm [shape: f32[2,2,128], index: 3, kind: output, shape index: {1}]  }
   0x1   :  { %11 = vsyncpa [#allocation5 + $0x1], 0 }
   0x2   :  { %12 = vsyncpa [#allocation7], 0 }
   0x3   :  { %14 = vsyncpa [#allocation7 + $0x1], 0  ;;  %s4054_s12 = smov 0   ;;  %s4056_s13 = smov 0  }
   0x4   :  { %s4058_s14 = smov 0   ;;  %s4060_s15 = smov 0  }
   0x5 LB: > { %s4075_s16 = sadd.s32 4294967295, %s4020_s15   ;;  %s3164_s17 = sadd.s32 4294967294, %s4020_s15   ;;  %s4020_s15 = sphi %s4060_s15, %s5099_s15   ;;  %s4016_s14 = sphi %s4058_s14, %s5098_s14   ;;  %s4012_s13 = sphi %s4056_s13, %s5097_s13   ;;  %s4008_s12 = sphi %s4054_s12, %s5096_s12  }
   0x6   : > { %s4079_s18 = sadd.s32 1, %s4020_s15   ;;  %s74_s19 = sadd.s32 1, %s4016_s14 }
   0x7   : > { %s71_s20 = ssub.s32 %s4020_s15, %s4079_s18  ;;  %p84_p0 = scmp.ne.s32.totalorder %s4016_s14, %s4012_s13 }
   0x8   : > { %p72_p1 = scmp.eq.s32.totalorder %s71_s20, 0  ;;  %p85_p2 = scmp.eq.s32.totalorder %s4075_s16, 1 }
   0x9   : > { %p90_p3 = scmp.ne.s32.totalorder %s4012_s13, %s4008_s12  ;;  %p91_p4 = scmp.eq.s32.totalorder %s3164_s17, 1 }
   0xa   : > { %s4090_s21 = scalar_select %p72_p1, %s4016_s14, %s74_s19  }
   0xb   : > { %p4092_p5 = por %p85_p2, %p84_p0  ;;  %p4096_p6 = por %p91_p4, %p90_p3 }
   0xc   : > { %p3167_p7 = scmp.ge.s32.totalorder %s4020_s15, 1  ;;  %p146_p8 = scmp.lt.s32.totalorder %s4020_s15, 3 }
   0xe   : > { %p147_p9 = pnand %p3167_p7, %p146_p8 }
   0xf   : > { %p175_p10 = scmp.lt.s32.totalorder (!%p147_p9), %s4075_s16, 1  ;;  %s4023_s29 = smov (!%p147_p9), 4  }
  0x10   : > { %150 = sbr.rel (%p147_p9) target bundleno = 932 (0x3a4), region = 28  ;;  %s4024_s30 = smov (!%p147_p9), 8  }
  0x11   : > { %s4025_s4 = smov (!%p147_p9), 12   ;;  %s4026_s5 = smov (!%p147_p9), 16  }
  0x12   : > { %s4027_s6 = smov (!%p147_p9), 20   ;;  %s4028_s7 = smov (!%p147_p9), 24  }
  0x13   : > { %s4029_s8 = smov (!%p147_p9), 28   ;;  %s4030_s19 = smov (!%p147_p9), 32  }
  0x14   : > { %s4031_s9 = smov (!%p147_p9), [#allocation4]  }
  0x15   : > { %vm213_vm0 = vcmask 31744   ;;  %vm216_vm1 = vcmask 25600   ;;  %v4022_v0 = vmov 0.0   ;;  %s176_s24 = scalar_select %p175_p10, %s4075_s16, 1  ;;  %vm462_vm2 = vcmask 27648  }
  0x16   : > { %214 = vst.msk [vmem:[#allocation2] sm:$0xff] %vm213_vm0, %v4022_v0  ;;  %215 = vst.msk [vmem:[#allocation2 + $0x8] sm:$0xff] %vm213_vm0, %v4022_v0  ;;  %vm719_vm3 = vcmask 60448   ;;  %vm976_vm4 = vcmask 93248   ;;  %vm2733_vm5 = vcmask 1041408   ;;  %vm1233_vm6 = vcmask 126048  }
  0x17   : > { %218 = vst.msk [vmem:[#allocation2 + $0x18] sm:$0xff] %vm213_vm0, %v4022_v0  ;;  %219 = vst.msk [vmem:[#allocation2 + $0x20] sm:$0xff] %vm213_vm0, %v4022_v0  ;;  %s3502_s25 = sshll.u32 %s176_s24, 8  ;;  %vm1490_vm7 = vcmask 158848   ;;  %vm1747_vm8 = vcmask 191648   ;;  %vm2005_vm9 = vcmask 224448  }
  0x18   : > { %221 = vst.msk [vmem:[#allocation2 + $0x30] sm:$0xff] %vm213_vm0, %v4022_v0  ;;  %222 = vst.msk [vmem:[#allocation2 + $0x38] sm:$0xff] %vm213_vm0, %v4022_v0  ;;  %s4163_s28 = scalar_lea.vmem %s5090_s0, %s3502_s25  ;;  %vm2262_vm10 = vcmask 257248   ;;  %vm2519_vm11 = vcmask 290048   ;;  %vm2684_vm12 = vcmask 293888   ;;  %s4922_s25 = sand.u32 1, %s4012_s13  }
  0x19   : > { %224 = vst.msk [vmem:[#allocation2 + $0x48] sm:$0xff] %vm213_vm0, %v4022_v0  ;;  %225 = vst.msk [vmem:[#allocation2 + $0x50] sm:$0xff] %vm213_vm0, %v4022_v0  ;;  %v181_v1 = vld [vmem:[%s4163_s28] sm:$0xff]  ;;  %v182_v2 = vld [vmem:[%s4163_s28 + $0x8] sm:$0xff]  ;;  %s3168_s26 = sshll.u32 %s4922_s25, 8  ;;  %s3934_s10 = sshll.u32 %s4031_s9, 4  ;;  %s3935_s10 = int_to_ptr.vmem [resolvable:$false] %s3934_s10 }
  0x1a   : > { %227 = vst.msk [vmem:[#allocation2 + $0x60] sm:$0xff] %vm213_vm0, %v4022_v0  ;;  %228 = vst.msk [vmem:[#allocation2 + $0x68] sm:$0xff] %vm213_vm0, %v4022_v0  ;;  %v183_v3 = vld [vmem:[%s4163_s28 + $0x10] sm:$0xff]  ;;  %v184_v4 = vld [vmem:[%s4163_s28 + $0x18] sm:$0xff]  ;;  %s4929_s27 = scalar_lea.vmem [#allocation4], %s3168_s26  ;;  %s3936_s11 = scalar_lea.vmem %s3935_s10, 8192 }
  0x1b   : > { %230 = vst.msk [vmem:[#allocation2 + $0x78] sm:$0xff] %vm213_vm0, %v4022_v0  ;;  %231 = vst.msk [vmem:[#allocation2 + $0x80] sm:$0xff] %vm213_vm0, %v4022_v0  ;;  %v185_v5 = vld [vmem:[%s4163_s28 + $0x20] sm:$0xff]  ;;  %v186_v6 = vld [vmem:[%s4163_s28 + $0x28] sm:$0xff] }
  0x1c   : > { %233 = vst.msk [vmem:[#allocation2 + $0x90] sm:$0xff] %vm213_vm0, %v4022_v0  ;;  %234 = vst.msk [vmem:[#allocation2 + $0x98] sm:$0xff] %vm213_vm0, %v4022_v0  ;;  %v187_v9 = vld [vmem:[%s4163_s28 + $0x30] sm:$0xff]  ;;  %v188_v11 = vld [vmem:[%s4163_s28 + $0x38] sm:$0xff] }
  0x1d   : > { %236 = vst.msk [vmem:[#allocation2 + $0xa8] sm:$0xff] %vm213_vm0, %v4022_v0  ;;  %237 = vst.msk [vmem:[#allocation2 + $0xb0] sm:$0xff] %vm213_vm0, %v4022_v0  ;;  %v495_v7 = vld [vmem:[#allocation2 + $0x1] sm:$0xff]  ;;  %v191_v14 = vld [vmem:[%s4163_s28 + $0x50] sm:$0xff] }
  0x1e   : > { %239 = vst.msk [vmem:[#allocation2 + $0xc0] sm:$0xff] %vm213_vm0, %v4022_v0  ;;  %240 = vst.msk [vmem:[#allocation2 + $0xc8] sm:$0xff] %vm213_vm0, %v4022_v0  ;;  %v3535_v10 = vpack.c.bf16 %v495_v7, %v495_v7  ;;  %v189_v12 = vld [vmem:[%s4163_s28 + $0x40] sm:$0xff]  ;;  %v190_v13 = vld [vmem:[%s4163_s28 + $0x48] sm:$0xff] }
  0x1f   : > { %242 = vst.msk [vmem:[#allocation2 + $0xd8] sm:$0xff] %vm213_vm0, %v4022_v0  ;;  %243 = vst.msk [vmem:[#allocation2 + $0xe0] sm:$0xff] %vm213_vm0, %v4022_v0  ;;  %v192_v15 = vld [vmem:[%s4163_s28 + $0x58] sm:$0xff]  ;;  %v193_v16 = vld [vmem:[%s4163_s28 + $0x60] sm:$0xff] }
  0x20   : > { %245 = vst.msk [vmem:[#allocation2 + $0xf0] sm:$0xff] %vm213_vm0, %v4022_v0  ;;  %246 = vst.msk [vmem:[#allocation2 + $0xf8] sm:$0xff] %vm213_vm0, %v4022_v0  ;;  %623 = vrot.lane.b32.xlu0 %v3535_v10, %s4023_s29  ;;  %v194_v18 = vld [vmem:[%s4163_s28 + $0x68] sm:$0xff]  ;;  %v195_v19 = vld [vmem:[%s4163_s28 + $0x70] sm:$0xff] }
  0x21   : > { %248 = vst.msk [vmem:[#allocation2 + $0x108] sm:$0xff] %vm213_vm0, %v4022_v0  ;;  %249 = vst.msk [vmem:[#allocation2 + $0x110] sm:$0xff] %vm213_vm0, %v4022_v0  ;;  %v196_v20 = vld [vmem:[%s4163_s28 + $0x78] sm:$0xff]  ;;  %v197_v21 = vld [vmem:[%s4163_s28 + $0x80] sm:$0xff] }
  0x22   : > { %251 = vst.msk [vmem:[#allocation2 + $0x120] sm:$0xff] %vm213_vm0, %v4022_v0  ;;  %252 = vst.msk [vmem:[#allocation2 + $0x128] sm:$0xff] %vm213_vm0, %v4022_v0  ;;  %v198_v22 = vld [vmem:[%s4163_s28 + $0x88] sm:$0xff]  ;;  %v199_v23 = vld [vmem:[%s4163_s28 + $0x90] sm:$0xff] }
  0x23   : > { %254 = vst.msk [vmem:[#allocation2 + $0x138] sm:$0xff] %vm213_vm0, %v4022_v0  ;;  %255 = vst.msk [vmem:[#allocation2 + $0x140] sm:$0xff] %vm213_vm0, %v4022_v0  ;;  %v200_v24 = vld [vmem:[%s4163_s28 + $0x98] sm:$0xff]  ;;  %v201_v25 = vld [vmem:[%s4163_s28 + $0xa0] sm:$0xff] }
  0x24   : > { %257 = vst.msk [vmem:[#allocation2 + $0x150] sm:$0xff] %vm213_vm0, %v4022_v0  ;;  %258 = vst.msk [vmem:[#allocation2 + $0x158] sm:$0xff] %vm213_vm0, %v4022_v0  ;;  %v202_v26 = vld [vmem:[%s4163_s28 + $0xa8] sm:$0xff]  ;;  %v203_v33 = vld [vmem:[%s4163_s28 + $0xb0] sm:$0xff] }
  0x25   : > { %260 = vst.msk [vmem:[#allocation2 + $0x168] sm:$0xff] %vm213_vm0, %v4022_v0  ;;  %261 = vst.msk [vmem:[#allocation2 + $0x170] sm:$0xff] %vm213_vm0, %v4022_v0  ;;  %v204_v34 = vld [vmem:[%s4163_s28 + $0xb8] sm:$0xff]  ;;  %v205_v41 = vld [vmem:[%s4163_s28 + $0xc0] sm:$0xff] }
  0x26   : > { %263 = vst.msk [vmem:[#allocation2 + $0x180] sm:$0xff] %vm213_vm0, %v4022_v0  ;;  %264 = vst.msk [vmem:[#allocation2 + $0x188] sm:$0xff] %vm213_vm0, %v4022_v0  ;;  %v206_v42 = vld [vmem:[%s4163_s28 + $0xc8] sm:$0xff]  ;;  %v207_v43 = vld [vmem:[%s4163_s28 + $0xd0] sm:$0xff] }
  0x27   : > { %266 = vst.msk [vmem:[#allocation2 + $0x198] sm:$0xff] %vm213_vm0, %v4022_v0  ;;  %267 = vst.msk [vmem:[#allocation2 + $0x1a0] sm:$0xff] %vm213_vm0, %v4022_v0  ;;  %v208_v45 = vld [vmem:[%s4163_s28 + $0xd8] sm:$0xff]  ;;  %v209_v46 = vld [vmem:[%s4163_s28 + $0xe0] sm:$0xff] }
  0x28   : > { %217 = vst.msk [vmem:[#allocation2 + $0x10] sm:$0x3] %vm216_vm1, %v4022_v0  ;;  %220 = vst.msk [vmem:[#allocation2 + $0x28] sm:$0x3] %vm216_vm1, %v4022_v0  ;;  %v210_v47 = vld [vmem:[%s4163_s28 + $0xe8] sm:$0xff]  ;;  %v302_v60 = vld [vmem:[#allocation2] sm:$0xff] }
  0x29   : > { %223 = vst.msk [vmem:[#allocation2 + $0x40] sm:$0x3] %vm216_vm1, %v4022_v0  ;;  %226 = vst.msk [vmem:[#allocation2 + $0x58] sm:$0x3] %vm216_vm1, %v4022_v0  ;;  %v3503_v63 = vpack.c.bf16 %v302_v60, %v302_v60 }
  0x2a   : > { %229 = vst.msk [vmem:[#allocation2 + $0x70] sm:$0x3] %vm216_vm1, %v4022_v0  ;;  %232 = vst.msk [vmem:[#allocation2 + $0x88] sm:$0x3] %vm216_vm1, %v4022_v0 }
  0x2b   : > { %235 = vst.msk [vmem:[#allocation2 + $0xa0] sm:$0x3] %vm216_vm1, %v4022_v0  ;;  %238 = vst.msk [vmem:[#allocation2 + $0xb8] sm:$0x3] %vm216_vm1, %v4022_v0 }
  0x2c   : > { %241 = vst.msk [vmem:[#allocation2 + $0xd0] sm:$0x3] %vm216_vm1, %v4022_v0  ;;  %244 = vst.msk [vmem:[#allocation2 + $0xe8] sm:$0x3] %vm216_vm1, %v4022_v0 }
  0x2d   : > { %247 = vst.msk [vmem:[#allocation2 + $0x100] sm:$0x3] %vm216_vm1, %v4022_v0  ;;  %250 = vst.msk [vmem:[#allocation2 + $0x118] sm:$0x3] %vm216_vm1, %v4022_v0 }
  0x2e   : > { %253 = vst.msk [vmem:[#allocation2 + $0x130] sm:$0x3] %vm216_vm1, %v4022_v0  ;;  %256 = vst.msk [vmem:[#allocation2 + $0x148] sm:$0x3] %vm216_vm1, %v4022_v0 }
  0x2f   : > { %259 = vst.msk [vmem:[#allocation2 + $0x160] sm:$0x3] %vm216_vm1, %v4022_v0  ;;  %262 = vst.msk [vmem:[#allocation2 + $0x178] sm:$0x3] %vm216_vm1, %v4022_v0  ;;  %v496_v8 = vld [vmem:[#allocation2 + $0x9] sm:$0xff] }
  0x30   : > { %265 = vst.msk [vmem:[#allocation2 + $0x190] sm:$0x3] %vm216_vm1, %v4022_v0  ;;  %268 = vst.msk [vmem:[#allocation2 + $0x1a8] sm:$0x3] %vm216_vm1, %v4022_v0  ;;  %v3536_v17 = vpack.c.bf16 %v496_v8, %v496_v8 }
  0x31   : > { %270 = vst.msk [vmem:[#allocation2 + $0x19] sm:$0xff] %vm213_vm0, %v181_v1  ;;  %271 = vst.msk [vmem:[#allocation2 + $0x21] sm:$0xff] %vm213_vm0, %v182_v2  ;;  %v303_v1 = vld [vmem:[#allocation2 + $0x8] sm:$0xff] }
  0x32   : > { %272 = vst.msk [vmem:[#allocation2 + $0x31] sm:$0xff] %vm213_vm0, %v183_v3  ;;  %273 = vst.msk [vmem:[#allocation2 + $0x39] sm:$0xff] %vm213_vm0, %v184_v4  ;;  %625 = vrot.lane.b32.xlu0 %v3536_v17, %s4023_s29  ;;  %v3504_v3 = vpack.c.bf16 %v303_v1, %v303_v1 }
  0x33   : > { %274 = vst.msk [vmem:[#allocation2 + $0x49] sm:$0xff] %vm213_vm0, %v185_v5  ;;  %275 = vst.msk [vmem:[#allocation2 + $0x51] sm:$0xff] %vm213_vm0, %v186_v6 }
  0x34   : > { %276 = vst.msk [vmem:[#allocation2 + $0x61] sm:$0xff] %vm213_vm0, %v187_v9  ;;  %277 = vst.msk [vmem:[#allocation2 + $0x69] sm:$0xff] %vm213_vm0, %v188_v11 }
  0x35   : > { %278 = vst.msk [vmem:[#allocation2 + $0x79] sm:$0xff] %vm213_vm0, %v189_v12  ;;  %279 = vst.msk [vmem:[#allocation2 + $0x81] sm:$0xff] %vm213_vm0, %v190_v13 }
  0x36   : > { %280 = vst.msk [vmem:[#allocation2 + $0x91] sm:$0xff] %vm213_vm0, %v191_v14  ;;  %281 = vst.msk [vmem:[#allocation2 + $0x99] sm:$0xff] %vm213_vm0, %v192_v15 }
  0x37   : > { %282 = vst.msk [vmem:[#allocation2 + $0xa9] sm:$0xff] %vm213_vm0, %v193_v16  ;;  %283 = vst.msk [vmem:[#allocation2 + $0xb1] sm:$0xff] %vm213_vm0, %v194_v18 }
  0x38   : > { %284 = vst.msk [vmem:[#allocation2 + $0xc1] sm:$0xff] %vm213_vm0, %v195_v19  ;;  %285 = vst.msk [vmem:[#allocation2 + $0xc9] sm:$0xff] %vm213_vm0, %v196_v20  ;;  %v497_v27 = vld [vmem:[#allocation2 + $0x19] sm:$0xff]  ;;  %v498_v28 = vld [vmem:[#allocation2 + $0x21] sm:$0xff] }
  0x39   : > { %286 = vst.msk [vmem:[#allocation2 + $0xd9] sm:$0xff] %vm213_vm0, %v197_v21  ;;  %287 = vst.msk [vmem:[#allocation2 + $0xe1] sm:$0xff] %vm213_vm0, %v198_v22  ;;  %v499_v29 = vld [vmem:[#allocation2 + $0x31] sm:$0xff]  ;;  %v4210_v30 = vpack.c.bf16 %v497_v27, %v497_v27  ;;  %v4219_v35 = vpack.c.bf16 %v498_v28, %v498_v28  ;;  %v500_v36 = vld [vmem:[#allocation2 + $0x39] sm:$0xff] }
  0x3a   : > { %288 = vst.msk [vmem:[#allocation2 + $0xf1] sm:$0xff] %vm213_vm0, %v199_v23  ;;  %289 = vst.msk [vmem:[#allocation2 + $0xf9] sm:$0xff] %vm213_vm0, %v200_v24  ;;  %v4213_v31 = vpack.c.bf16 %v499_v29, %v499_v29  ;;  %v501_v32 = vld [vmem:[#allocation2 + $0x49] sm:$0xff]  ;;  %v4229_v39 = vpack.c.bf16 %v500_v36, %v500_v36  ;;  %v502_v40 = vld [vmem:[#allocation2 + $0x51] sm:$0xff] }
  0x3b   : > { %290 = vst.msk [vmem:[#allocation2 + $0x109] sm:$0xff] %vm213_vm0, %v201_v25  ;;  %291 = vst.msk [vmem:[#allocation2 + $0x111] sm:$0xff] %vm213_vm0, %v202_v26  ;;  %627 = vrot.lane.b32.xlu1 %v4210_v30, %s4023_s29  ;;  %v4225_v37 = vpack.c.bf16 %v501_v32, %v501_v32  ;;  %v503_v38 = vld [vmem:[#allocation2 + $0x61] sm:$0xff]  ;;  %v4247_v49 = vpack.c.bf16 %v502_v40, %v502_v40  ;;  %v504_v50 = vld [vmem:[#allocation2 + $0x69] sm:$0xff] }
  0x3c   : > { %292 = vst.msk [vmem:[#allocation2 + $0x121] sm:$0xff] %vm213_vm0, %v203_v33  ;;  %293 = vst.msk [vmem:[#allocation2 + $0x129] sm:$0xff] %vm213_vm0, %v204_v34  ;;  %631 = vrot.lane.b32.xlu0 %v4213_v31, %s4023_s29  ;;  %v3543_v44 = vpack.c.bf16 %v503_v38, %v503_v38  ;;  %v505_v48 = vld [vmem:[#allocation2 + $0x79] sm:$0xff]  ;;  %v3544_v53 = vpack.c.bf16 %v504_v50, %v504_v50  ;;  %v506_v54 = vld [vmem:[#allocation2 + $0x81] sm:$0xff] }
  0x3d   : > { %294 = vst.msk [vmem:[#allocation2 + $0x139] sm:$0xff] %vm213_vm0, %v205_v41  ;;  %295 = vst.msk [vmem:[#allocation2 + $0x141] sm:$0xff] %vm213_vm0, %v206_v42  ;;  %v3545_v51 = vpack.c.bf16 %v505_v48, %v505_v48  ;;  %v507_v52 = vld [vmem:[#allocation2 + $0x91] sm:$0xff]  ;;  %v3546_v57 = vpack.c.bf16 %v506_v54, %v506_v54  ;;  %v508_v58 = vld [vmem:[#allocation2 + $0x99] sm:$0xff] }
  0x3e   : > { %296 = vst.msk [vmem:[#allocation2 + $0x151] sm:$0xff] %vm213_vm0, %v207_v43  ;;  %297 = vst.msk [vmem:[#allocation2 + $0x159] sm:$0xff] %vm213_vm0, %v208_v45  ;;  %v3547_v55 = vpack.c.bf16 %v507_v52, %v507_v52  ;;  %v509_v56 = vld [vmem:[#allocation2 + $0xa9] sm:$0xff]  ;;  %v304_v61 = vld [vmem:[#allocation2 + $0x18] sm:$0xff]  ;;  %v3548_v2 = vpack.c.bf16 %v508_v58, %v508_v58 }
  0x3f   : > { %629 = vrot.lane.b32.xlu1 %v4219_v35, %s4023_s29  ;;  %298 = vst.msk [vmem:[#allocation2 + $0x169] sm:$0xff] %vm213_vm0, %v209_v46  ;;  %299 = vst.msk [vmem:[#allocation2 + $0x171] sm:$0xff] %vm213_vm0, %v210_v47  ;;  %v3549_v59 = vpack.c.bf16 %v509_v56, %v509_v56  ;;  %v511_v62 = vld [vmem:[#allocation2 + $0xc1] sm:$0xff]  ;;  %v4255_v0 = vpack.c.bf16 %v304_v61, %v304_v61  ;;  %v510_v5 = vld [vmem:[#allocation2 + $0xb1] sm:$0xff] }
  0x40   : > { %635 = vrot.lane.b32.xlu0 %v4225_v37, %s4023_s29  ;;  %v305_v4 = vld [vmem:[#allocation2 + $0x20] sm:$0xff]  ;;  %463 = vst.msk [vmem:[#allocation3] sm:$0xf] %vm462_vm2, %v3503_v63  ;;  %v306_v7 = vld [vmem:[#allocation2 + $0x30] sm:$0xff]  ;;  %v307_v8 = vld [vmem:[#allocation2 + $0x38] sm:$0xff]  ;;  %v3551_v9 = vpack.c.bf16 %v511_v62, %v511_v62  ;;  %v3550_v21 = vpack.c.bf16 %v510_v5, %v510_v5 }
  0x41   : > { %465 = vst.msk [vmem:[#allocation3 + $0x8] sm:$0xf] %vm462_vm2, %v4255_v0  ;;  %v4261_v6 = vpack.c.bf16 %v305_v4, %v305_v4  ;;  %v4264_v10 = vld [vmem:[#allocation2 + $0xd9] sm:$0xff]  ;;  %464 = vst.msk [vmem:[#allocation3 + $0x4] sm:$0xf] %vm462_vm2, %v3504_v3  ;;  %v4267_v11 = vpack.c.bf16 %v306_v7, %v306_v7  ;;  %v4269_v12 = vpack.c.bf16 %v307_v8, %v307_v8  ;;  %v308_v13 = vld [vmem:[#allocation2 + $0x48] sm:$0xff] }
  0x42   : > { %v309_v14 = vld [vmem:[#allocation2 + $0x50] sm:$0xff]  ;;  %v4275_v16 = vpack.c.bf16 %v308_v13, %v308_v13  ;;  %v310_v18 = vld [vmem:[#allocation2 + $0x60] sm:$0xff]  ;;  %v311_v19 = vld [vmem:[#allocation2 + $0x68] sm:$0xff]  ;;  %v3553_v40 = vpack.c.bf16 %v4264_v10, %v4264_v10 }
  0x43   : > { %633 = vrot.lane.b32.xlu1 %v4229_v39, %s4023_s29  ;;  %v4271_v15 = vld [vmem:[#allocation2 + $0xc9] sm:$0xff]  ;;  %466 = vst.msk [vmem:[#allocation3 + $0xc] sm:$0xf] %vm462_vm2, %v4261_v6  ;;  %v4277_v17 = vpack.c.bf16 %v309_v14, %v309_v14  ;;  %v312_v20 = vld [vmem:[#allocation2 + $0x78] sm:$0xff]  ;;  %467 = vst.msk [vmem:[#allocation3 + $0x10] sm:$0xf] %vm462_vm2, %v4267_v11  ;;  %v4284_v22 = vpack.c.bf16 %v310_v18, %v310_v18  ;;  %v4286_v23 = vpack.c.bf16 %v311_v19, %v311_v19 }
  0x44   : > { %639 = vrot.lane.b32.xlu0 %v3543_v44, %s4023_s29  ;;  %468 = vst.msk [vmem:[#allocation3 + $0x14] sm:$0xf] %vm462_vm2, %v4269_v12  ;;  %v4288_v24 = vpack.c.bf16 %v312_v20, %v312_v20  ;;  %v313_v25 = vld [vmem:[#allocation2 + $0x80] sm:$0xff]  ;;  %v314_v26 = vld [vmem:[#allocation2 + $0x90] sm:$0xff]  ;;  %v315_v27 = vld [vmem:[#allocation2 + $0x98] sm:$0xff]  ;;  %v3552_v54 = vpack.c.bf16 %v4271_v15, %v4271_v15 }
  0x45   : > { %v515_v28 = vld [vmem:[#allocation2 + $0xf1] sm:$0xff]  ;;  %469 = vst.msk [vmem:[#allocation3 + $0x18] sm:$0xf] %vm462_vm2, %v4275_v16  ;;  %470 = vst.msk [vmem:[#allocation3 + $0x1c] sm:$0xf] %vm462_vm2, %v4277_v17  ;;  %v4294_v29 = vpack.c.bf16 %v313_v25, %v313_v25  ;;  %v4296_v32 = vpack.c.bf16 %v314_v26, %v314_v26  ;;  %v4298_v33 = vpack.c.bf16 %v315_v27, %v315_v27  ;;  %v316_v34 = vld [vmem:[#allocation2 + $0xa8] sm:$0xff] }
  0x46   : > { %v317_v36 = vld [vmem:[#allocation2 + $0xb0] sm:$0xff]  ;;  %v318_v38 = vld [vmem:[#allocation2 + $0xc0] sm:$0xff]  ;;  %471 = vst.msk [vmem:[#allocation3 + $0x20] sm:$0xf] %vm462_vm2, %v4284_v22  ;;  %472 = vst.msk [vmem:[#allocation3 + $0x24] sm:$0xf] %vm462_vm2, %v4286_v23  ;;  %v4309_v41 = vpack.c.bf16 %v316_v34, %v316_v34  ;;  %v3555_v61 = vpack.c.bf16 %v515_v28, %v515_v28 }
  0x47   : > { %637 = vrot.lane.b32.xlu1 %v4247_v49, %s4023_s29  ;;  %473 = vst.msk [vmem:[#allocation3 + $0x28] sm:$0xf] %vm462_vm2, %v4288_v24  ;;  %v4311_v42 = vpack.c.bf16 %v317_v36, %v317_v36  ;;  %v4313_v43 = vpack.c.bf16 %v318_v38, %v318_v38  ;;  %v319_v44 = vld [vmem:[#allocation2 + $0xc8] sm:$0xff]  ;;  %v320_v45 = vld [vmem:[#allocation2 + $0xd8] sm:$0xff]  ;;  %v321_v46 = vld [vmem:[#allocation2 + $0xe0] sm:$0xff] }
  0x48   : > { %643 = vrot.lane.b32.xlu0 %v3545_v51, %s4023_s29  ;;  %474 = vst.msk [vmem:[#allocation3 + $0x2c] sm:$0xf] %vm462_vm2, %v4294_v29  ;;  %475 = vst.msk [vmem:[#allocation3 + $0x30] sm:$0xf] %vm462_vm2, %v4296_v32  ;;  %v4321_v47 = vpack.c.bf16 %v319_v44, %v319_v44  ;;  %v4323_v48 = vpack.c.bf16 %v320_v45, %v320_v45  ;;  %v4325_v50 = vpack.c.bf16 %v321_v46, %v321_v46  ;;  %v322_v51 = vld [vmem:[#allocation2 + $0xf0] sm:$0xff]  ;;  %v323_v52 = vld [vmem:[#allocation2 + $0xf8] sm:$0xff] }
  0x49   : > { %476 = vst.msk [vmem:[#allocation3 + $0x34] sm:$0xf] %vm462_vm2, %v4298_v33  ;;  %477 = vst.msk [vmem:[#allocation3 + $0x38] sm:$0xf] %vm462_vm2, %v4309_v41  ;;  %v4338_v56 = vpack.c.bf16 %v323_v52, %v323_v52  ;;  %v325_v58 = vld [vmem:[#allocation2 + $0x110] sm:$0xff]  ;;  %v326_v63 = vld [vmem:[#allocation2 + $0x120] sm:$0xff] }
  0x4a   : > { %478 = vst.msk [vmem:[#allocation3 + $0x3c] sm:$0xf] %vm462_vm2, %v4311_v42  ;;  %479 = vst.msk [vmem:[#allocation3 + $0x40] sm:$0xf] %vm462_vm2, %v4313_v43  ;;  %v3526_v60 = vpack.c.bf16 %v325_v58, %v325_v58  ;;  %v517_v62 = vld [vmem:[#allocation2 + $0x109] sm:$0xff]  ;;  %v3527_v3 = vpack.c.bf16 %v326_v63, %v326_v63  ;;  %v516_v5 = vld [vmem:[#allocation2 + $0xf9] sm:$0xff] }
  0x4b   : > { %641 = vrot.lane.b32.xlu1 %v3544_v53, %s4023_s29  ;;  %v324_v53 = vld [vmem:[#allocation2 + $0x108] sm:$0xff]  ;;  %480 = vst.msk [vmem:[#allocation3 + $0x44] sm:$0xf] %vm462_vm2, %v4321_v47  ;;  %481 = vst.msk [vmem:[#allocation3 + $0x48] sm:$0xf] %vm462_vm2, %v4323_v48  ;;  %v3557_v7 = vpack.c.bf16 %v517_v62, %v517_v62  ;;  %v329_v10 = vld [vmem:[#allocation2 + $0x140] sm:$0xff]  ;;  %v3556_v13 = vpack.c.bf16 %v516_v5, %v516_v5 }
  0x4c   : > { %647 = vrot.lane.b32.xlu0 %v3547_v55, %s4023_s29  ;;  %v4336_v55 = vpack.c.bf16 %v322_v51, %v322_v51  ;;  %482 = vst.msk [vmem:[#allocation3 + $0x4c] sm:$0xf] %vm462_vm2, %v4325_v50  ;;  %484 = vst.msk [vmem:[#allocation3 + $0x54] sm:$0xf] %vm462_vm2, %v4338_v56  ;;  %v327_v1 = vld [vmem:[#allocation2 + $0x128] sm:$0xff]  ;;  %v3530_v15 = vpack.c.bf16 %v329_v10, %v329_v10  ;;  %v518_v18 = vld [vmem:[#allocation2 + $0x111] sm:$0xff] }
  0x4d   : > { %486 = vst.msk [vmem:[#allocation3 + $0x5c] sm:$0xf] %vm462_vm2, %v3526_v60  ;;  %v3528_v4 = vpack.c.bf16 %v327_v1, %v327_v1  ;;  %487 = vst.msk [vmem:[#allocation3 + $0x60] sm:$0xf] %vm462_vm2, %v3527_v3  ;;  %v519_v8 = vld [vmem:[#allocation2 + $0x121] sm:$0xff]  ;;  %v521_v20 = vld [vmem:[#allocation2 + $0x139] sm:$0xff]  ;;  %v3558_v26 = vpack.c.bf16 %v518_v18, %v518_v18 }
  0x4e   : > { %483 = vst.msk [vmem:[#allocation3 + $0x50] sm:$0xf] %vm462_vm2, %v4336_v55  ;;  %v3559_v19 = vpack.c.bf16 %v519_v8, %v519_v8  ;;  %490 = vst.msk [vmem:[#allocation3 + $0x6c] sm:$0xf] %vm462_vm2, %v3530_v15  ;;  %v331_v25 = vld [vmem:[#allocation2 + $0x158] sm:$0xff]  ;;  %v520_v34 = vld [vmem:[#allocation2 + $0x129] sm:$0xff]  ;;  %v3561_v36 = vpack.c.bf16 %v521_v20, %v521_v20 }
  0x4f   : > { %645 = vrot.lane.b32.xlu1 %v3546_v57, %s4023_s29  ;;  %v3525_v57 = vpack.c.bf16 %v324_v53, %v324_v53  ;;  %488 = vst.msk [vmem:[#allocation3 + $0x64] sm:$0xf] %vm462_vm2, %v3528_v4  ;;  %v3532_v28 = vpack.c.bf16 %v331_v25, %v331_v25  ;;  %v523_v38 = vld [vmem:[#allocation2 + $0x151] sm:$0xff]  ;;  %v3560_v45 = vpack.c.bf16 %v520_v34, %v520_v34  ;;  %v522_v52 = vld [vmem:[#allocation2 + $0x141] sm:$0xff]  ;;  %v524_v58 = vld [vmem:[#allocation2 + $0x159] sm:$0xff] }
  0x50   : > { %651 = vrot.lane.b32.xlu0 %v3549_v59, %s4023_s29  ;;  %v514_v59 = vld [vmem:[#allocation2 + $0xe1] sm:$0xff]  ;;  %v333_v44 = vld [vmem:[#allocation2 + $0x170] sm:$0xff]  ;;  %v3563_v53 = vpack.c.bf16 %v523_v38, %v523_v38 }
  0x51   : > { %485 = vst.msk [vmem:[#allocation3 + $0x58] sm:$0xf] %vm462_vm2, %v3525_v57  ;;  %492 = vst.msk [vmem:[#allocation3 + $0x74] sm:$0xf] %vm462_vm2, %v3532_v28  ;;  %v3534_v51 = vpack.c.bf16 %v333_v44, %v333_v44  ;;  %v3562_v57 = vpack.c.bf16 %v522_v52, %v522_v52  ;;  %v752_v60 = vld [vmem:[#allocation2 + $0x2] sm:$0xff]  ;;  %v526_v62 = vld [vmem:[#allocation2 + $0x171] sm:$0xff] }
  0x52   : > { %v3567_v63 = vpack.c.bf16 %v752_v60, %v752_v60  ;;  %v754_v1 = vld [vmem:[#allocation2 + $0x1a] sm:$0xff]  ;;  %v753_v3 = vld [vmem:[#allocation2 + $0xa] sm:$0xff]  ;;  %v756_v5 = vld [vmem:[#allocation2 + $0x32] sm:$0xff] }
  0x53   : > { %649 = vrot.lane.b32.xlu1 %v3548_v2, %s4023_s29  ;;  %v3554_v2 = vpack.c.bf16 %v514_v59, %v514_v59  ;;  %494 = vst.msk [vmem:[#allocation3 + $0x7c] sm:$0xf] %vm462_vm2, %v3534_v51  ;;  %v4375_v4 = vpack.c.bf16 %v754_v1, %v754_v1  ;;  %v755_v8 = vld [vmem:[#allocation2 + $0x22] sm:$0xff]  ;;  %v758_v10 = vld [vmem:[#allocation2 + $0x4a] sm:$0xff]  ;;  %v759_v20 = vld [vmem:[#allocation2 + $0x52] sm:$0xff] }
  0x54   : > { %655 = vrot.lane.b32.xlu0 %v3551_v9, %s4023_s29  ;;  %v328_v9 = vld [vmem:[#allocation2 + $0x138] sm:$0xff]  ;;  %v4387_v15 = vpack.c.bf16 %v758_v10, %v758_v10  ;;  %v760_v18 = vld [vmem:[#allocation2 + $0x62] sm:$0xff]  ;;  %v766_v44 = vld [vmem:[#allocation2 + $0xaa] sm:$0xff] }
  0x55   : > { %v3529_v14 = vpack.c.bf16 %v328_v9, %v328_v9  ;;  %v4380_v9 = vpack.c.bf16 %v756_v5, %v756_v5  ;;  %v762_v25 = vld [vmem:[#allocation2 + $0x7a] sm:$0xff]  ;;  %v764_v34 = vld [vmem:[#allocation2 + $0x92] sm:$0xff]  ;;  %v763_v38 = vld [vmem:[#allocation2 + $0x82] sm:$0xff]  ;;  %v3581_v51 = vpack.c.bf16 %v766_v44, %v766_v44 }
  0x56   : > { %v4403_v28 = vpack.c.bf16 %v762_v25, %v762_v25  ;;  %v768_v52 = vld [vmem:[#allocation2 + $0xc2] sm:$0xff]  ;;  %v769_v60 = vld [vmem:[#allocation2 + $0xca] sm:$0xff]  ;;  %v778_v25 = vld [vmem:[#allocation2 + $0x13a] sm:$0xff] }
  0x57   : > { %653 = vrot.lane.b32.xlu1 %v3550_v21, %s4023_s29  ;;  %489 = vst.msk [vmem:[#allocation3 + $0x68] sm:$0xf] %vm462_vm2, %v3529_v14  ;;  %v330_v21 = vld [vmem:[#allocation2 + $0x150] sm:$0xff]  ;;  %v757_v14 = vld [vmem:[#allocation2 + $0x3a] sm:$0xff]  ;;  %v771_v1 = vld [vmem:[#allocation2 + $0xe2] sm:$0xff] }
  0x58   : > { %659 = vrot.lane.b32.xlu0 %v3553_v40, %s4023_s29  ;;  %v3531_v27 = vpack.c.bf16 %v330_v21, %v330_v21  ;;  %v332_v40 = vld [vmem:[#allocation2 + $0x168] sm:$0xff]  ;;  %v4395_v21 = vpack.c.bf16 %v760_v18, %v760_v18  ;;  %v3586_v5 = vpack.c.bf16 %v771_v1, %v771_v1  ;;  %v775_v18 = vld [vmem:[#allocation2 + $0x112] sm:$0xff] }
  0x59   : > { %v3533_v46 = vpack.c.bf16 %v332_v40, %v332_v40  ;;  %v4411_v40 = vpack.c.bf16 %v764_v34, %v764_v34  ;;  %v776_v10 = vld [vmem:[#allocation2 + $0x122] sm:$0xff]  ;;  %v777_v34 = vld [vmem:[#allocation2 + $0x12a] sm:$0xff]  ;;  %v780_v44 = vld [vmem:[#allocation2 + $0x152] sm:$0xff] }
  0x5a   : > { %491 = vst.msk [vmem:[#allocation3 + $0x70] sm:$0xf] %vm462_vm2, %v3531_v27  ;;  %v761_v27 = vld [vmem:[#allocation2 + $0x6a] sm:$0xff] }
  0x5b   : > { %657 = vrot.lane.b32.xlu1 %v3552_v54, %s4023_s29  ;;  %493 = vst.msk [vmem:[#allocation3 + $0x78] sm:$0xf] %vm462_vm2, %v3533_v46  ;;  %v525_v54 = vld [vmem:[#allocation2 + $0x169] sm:$0xff]  ;;  %v765_v46 = vld [vmem:[#allocation2 + $0x9a] sm:$0xff] }
  0x5c   : > { %663 = vrot.lane.b32.xlu0 %v3555_v61, %s4023_s29  ;;  %v3565_v59 = vpack.c.bf16 %v525_v54, %v525_v54  ;;  %v3564_v61 = vpack.c.bf16 %v524_v58, %v524_v58  ;;  %v767_v54 = vld [vmem:[#allocation2 + $0xb2] sm:$0xff]  ;;  %v770_v58 = vld [vmem:[#allocation2 + $0xda] sm:$0xff] }
  0x5f   : > { %661 = vrot.lane.b32.xlu1 %v3554_v2, %s4023_s29  ;;  %v3566_v2 = vpack.c.bf16 %v526_v62, %v526_v62  ;;  %v772_v62 = vld [vmem:[#allocation2 + $0xf2] sm:$0xff] }
  0x60   : > { %667 = vrot.lane.b32.xlu0 %v3557_v7, %s4023_s29  ;;  %v3568_v7 = vpack.c.bf16 %v753_v3, %v753_v3  ;;  %v774_v3 = vld [vmem:[#allocation2 + $0x10a] sm:$0xff] }
  0x63   : > { %665 = vrot.lane.b32.xlu1 %v3556_v13, %s4023_s29  ;;  %v4383_v13 = vpack.c.bf16 %v755_v8, %v755_v8  ;;  %v3589_v8 = vpack.c.bf16 %v774_v3, %v774_v3 }
  0x64   : > { %671 = vrot.lane.b32.xlu0 %v3559_v19, %s4023_s29  ;;  %v4391_v19 = vpack.c.bf16 %v757_v14, %v757_v14 }
  0x67   : > { %669 = vrot.lane.b32.xlu1 %v3558_v26, %s4023_s29  ;;  %v4399_v26 = vpack.c.bf16 %v759_v20, %v759_v20  ;;  %v3591_v20 = vpack.c.bf16 %v776_v10, %v776_v10 }
  0x68   : > { %675 = vrot.lane.b32.xlu0 %v3561_v36, %s4023_s29  ;;  %v4407_v36 = vpack.c.bf16 %v761_v27, %v761_v27  ;;  %v3590_v27 = vpack.c.bf16 %v775_v18, %v775_v18 }
  0x6b   : > { %673 = vrot.lane.b32.xlu1 %v3560_v45, %s4023_s29  ;;  %v4415_v45 = vpack.c.bf16 %v763_v38, %v763_v38  ;;  %v3593_v38 = vpack.c.bf16 %v778_v25, %v778_v25 }
  0x6c   : > { %679 = vrot.lane.b32.xlu0 %v3563_v53, %s4023_s29  ;;  %v4421_v53 = vpack.c.bf16 %v765_v46, %v765_v46  ;;  %v3592_v46 = vpack.c.bf16 %v777_v34, %v777_v34 }
  0x6f   : > { %677 = vrot.lane.b32.xlu1 %v3562_v57, %s4023_s29  ;;  %v3583_v57 = vpack.c.bf16 %v768_v52, %v768_v52  ;;  %v779_v52 = vld [vmem:[#allocation2 + $0x142] sm:$0xff] }
  0x70   : > { %683 = vrot.lane.b32.xlu0 %v3565_v59, %s4023_s29  ;;  %v3582_v59 = vpack.c.bf16 %v767_v54, %v767_v54  ;;  %v3595_v54 = vpack.c.bf16 %v780_v44, %v780_v44 }
  0x73   : > { %681 = vrot.lane.b32.xlu1 %v3564_v61, %s4023_s29  ;;  %v3585_v61 = vpack.c.bf16 %v770_v58, %v770_v58  ;;  %v3594_v58 = vpack.c.bf16 %v779_v52, %v779_v52 }
  0x74   : > { %880 = vrot.lane.b32.xlu0 %v3567_v63, %s4024_s30  ;;  %v3584_v63 = vpack.c.bf16 %v769_v60, %v769_v60  ;;  %v781_v60 = vld [vmem:[#allocation2 + $0x15a] sm:$0xff] }
  0x77   : > { %685 = vrot.lane.b32.xlu1 %v3566_v2, %s4023_s29  ;;  %v3587_v2 = vpack.c.bf16 %v772_v62, %v772_v62  ;;  %s3057_s29 = sshll.u32 %s4929_s27, 4  ;;  %s5028_s29 = int_to_ptr.vmem [resolvable:$true] %s3057_s29 }
  0x78   : > { %884 = vrot.lane.b32.xlu0 %v4375_v4, %s4024_s30  ;;  %p3937_p0 = scmp.lt.s32.totalorder %s5028_s29, %s3935_s10 }
  0x7b   : > { %882 = vrot.lane.b32.xlu1 %v3568_v7, %s4024_s30  ;;  %v773_v7 = vld [vmem:[#allocation2 + $0xfa] sm:$0xff] }
  0x7c   : > { %888 = vrot.lane.b32.xlu0 %v4380_v9, %s4024_s30  ;;  %v3588_v14 = vpack.c.bf16 %v773_v7, %v773_v7 }
  0x7f   : > { %886 = vrot.lane.b32.xlu1 %v4383_v13, %s4024_s30 }
  0x80   : > { %892 = vrot.lane.b32.xlu0 %v4387_v15, %s4024_s30 }
  0x83   : > { %890 = vrot.lane.b32.xlu1 %v4391_v19, %s4024_s30 }
  0x84   : > { %896 = vrot.lane.b32.xlu0 %v4395_v21, %s4024_s30 }
  0x87   : > { %894 = vrot.lane.b32.xlu1 %v4399_v26, %s4024_s30 }
  0x88   : > { %900 = vrot.lane.b32.xlu0 %v4403_v28, %s4024_s30 }
  0x8b   : > { %898 = vrot.lane.b32.xlu1 %v4407_v36, %s4024_s30 }
  0x8c   : > { %904 = vrot.lane.b32.xlu0 %v4411_v40, %s4024_s30 }
  0x8f   : > { %902 = vrot.lane.b32.xlu1 %v4415_v45, %s4024_s30 }
  0x90   : > { %908 = vrot.lane.b32.xlu0 %v3581_v51, %s4024_s30 }
  0x92   : > { %v624_v51 = vpop.permute.xlu0 %623 }
  0x93   : > { %906 = vrot.lane.b32.xlu1 %v4421_v53, %s4024_s30  ;;  %720 = vst.msk [vmem:[#allocation3] sm:$0xf] %vm719_vm3, %v624_v51 }
  0x94   : > { %912 = vrot.lane.b32.xlu0 %v3583_v57, %s4024_s30  ;;  %v782_v57 = vld [vmem:[#allocation2 + $0x16a] sm:$0xff] }
  0x95   : > { %v3597_v62 = vpack.c.bf16 %v782_v57, %v782_v57 }
  0x97   : > { %910 = vrot.lane.b32.xlu1 %v3582_v59, %s4024_s30 }
  0x98   : > { %916 = vrot.lane.b32.xlu0 %v3585_v61, %s4024_s30 }
  0x9b   : > { %914 = vrot.lane.b32.xlu1 %v3584_v63, %s4024_s30  ;;  %v3596_v63 = vpack.c.bf16 %v781_v60, %v781_v60 }
  0x9c   : > { %920 = vrot.lane.b32.xlu0 %v3587_v2, %s4024_s30  ;;  %v783_v2 = vld [vmem:[#allocation2 + $0x172] sm:$0xff] }
  0x9f   : > { %918 = vrot.lane.b32.xlu1 %v3586_v5, %s4024_s30  ;;  %v3598_v5 = vpack.c.bf16 %v783_v2, %v783_v2 }
  0xa0   : > { %924 = vrot.lane.b32.xlu0 %v3589_v8, %s4024_s30 }
  0xa3   : > { %922 = vrot.lane.b32.xlu1 %v3588_v14, %s4024_s30 }
  0xa4   : > { %928 = vrot.lane.b32.xlu0 %v3591_v20, %s4024_s30  ;;  %v626_v59 = vpop.permute.xlu0 %625 }
  0xa5   : > { %721 = vst.msk [vmem:[#allocation3 + $0x4] sm:$0xf] %vm719_vm3, %v626_v59 }
  0xa7   : > { %926 = vrot.lane.b32.xlu1 %v3590_v27, %s4024_s30 }
  0xa8   : > { %932 = vrot.lane.b32.xlu0 %v3593_v38, %s4024_s30 }
  0xab   : > { %930 = vrot.lane.b32.xlu1 %v3592_v46, %s4024_s30 }
  0xac   : > { %936 = vrot.lane.b32.xlu0 %v3595_v54, %s4024_s30 }
  0xad   : > { %v628_v61 = vpop.permute.xlu1 %627 }
  0xae   : > { %722 = vst.msk [vmem:[#allocation3 + $0x8] sm:$0xf] %vm719_vm3, %v628_v61  ;;  %v632_v1 = vpop.permute.xlu0 %631 }
  0xaf   : > { %934 = vrot.lane.b32.xlu1 %v3594_v58, %s4024_s30  ;;  %724 = vst.msk [vmem:[#allocation3 + $0x10] sm:$0xf] %vm719_vm3, %v632_v1 }
  0xb0   : > { %940 = vrot.lane.b32.xlu0 %v3597_v62, %s4024_s30 }
  0xb1   : > { %v630_v3 = vpop.permute.xlu1 %629 }
  0xb2   : > { %723 = vst.msk [vmem:[#allocation3 + $0xc] sm:$0xf] %vm719_vm3, %v630_v3  ;;  %v636_v7 = vpop.permute.xlu0 %635 }
  0xb3   : > { %938 = vrot.lane.b32.xlu1 %v3596_v63, %s4024_s30  ;;  %726 = vst.msk [vmem:[#allocation3 + $0x18] sm:$0xf] %vm719_vm3, %v636_v7 }
  0xb4   : > { %1137 = vrot.lane.b32.xlu0 %v4255_v0, %s4025_s4 }
  0xb5   : > { %v634_v8 = vpop.permute.xlu1 %633 }
  0xb6   : > { %725 = vst.msk [vmem:[#allocation3 + $0x14] sm:$0xf] %vm719_vm3, %v634_v8  ;;  %v640_v10 = vpop.permute.xlu0 %639 }
  0xb7   : > { %942 = vrot.lane.b32.xlu1 %v3598_v5, %s4024_s30  ;;  %728 = vst.msk [vmem:[#allocation3 + $0x20] sm:$0xf] %vm719_vm3, %v640_v10  ;;  %v3911_v5 = vld [vmem:[%s5091_s1 + $0x10] ss:$0 sps:$4 sm:$0x33]  }
  0xb8   : > { %1141 = vrot.lane.b32.xlu0 %v4267_v11, %s4025_s4  ;;  %3855 = vmatprep.subr.msk.bf16.mxu0 %vm2733_vm5, %v3911_v5  ;;  %v1270_v10 = vld [vmem:[#allocation2 + $0x49] sm:$0xff] }
  0xb9   : > { %v638_v14 = vpop.permute.xlu1 %637  ;;  %3856 = vmatprep.subr.msk.bf16.mxu1 %vm2733_vm5, %v3911_v5 }
  0xba   : > { %727 = vst.msk [vmem:[#allocation3 + $0x1c] sm:$0xf] %vm719_vm3, %v638_v14  ;;  %v644_v18 = vpop.permute.xlu0 %643 }
  0xbb   : > { %1139 = vrot.lane.b32.xlu1 %v4261_v6, %s4025_s4  ;;  %730 = vst.msk [vmem:[#allocation3 + $0x28] sm:$0xf] %vm719_vm3, %v644_v18  ;;  %v1272_v18 = vld [vmem:[#allocation2 + $0x61] sm:$0xff] }
  0xbc   : > { %1145 = vrot.lane.b32.xlu0 %v4275_v16, %s4025_s4 }
  0xbd   : > { %v642_v0 = vpop.permute.xlu1 %641 }
  0xbe   : > { %729 = vst.msk [vmem:[#allocation3 + $0x24] sm:$0xf] %vm719_vm3, %v642_v0  ;;  %v648_v20 = vpop.permute.xlu0 %647 }
  0xbf   : > { %1143 = vrot.lane.b32.xlu1 %v4269_v12, %s4025_s4  ;;  %732 = vst.msk [vmem:[#allocation3 + $0x30] sm:$0xf] %vm719_vm3, %v648_v20 }
  0xc0   : > { %1149 = vrot.lane.b32.xlu0 %v4284_v22, %s4025_s4 }
  0xc1   : > { %v646_v25 = vpop.permute.xlu1 %645 }
  0xc2   : > { %731 = vst.msk [vmem:[#allocation3 + $0x2c] sm:$0xf] %vm719_vm3, %v646_v25  ;;  %v652_v6 = vpop.permute.xlu0 %651  ;;  %v3637_v25 = vpack.c.bf16 %v1272_v18, %v1272_v18 }
  0xc3   : > { %1147 = vrot.lane.b32.xlu1 %v4277_v17, %s4025_s4  ;;  %734 = vst.msk [vmem:[#allocation3 + $0x38] sm:$0xf] %vm719_vm3, %v652_v6 }
  0xc4   : > { %1153 = vrot.lane.b32.xlu0 %v4288_v24, %s4025_s4 }
  0xc5   : > { %v650_v27 = vpop.permute.xlu1 %649 }
  0xc6   : > { %733 = vst.msk [vmem:[#allocation3 + $0x34] sm:$0xf] %vm719_vm3, %v650_v27  ;;  %v656_v34 = vpop.permute.xlu0 %655 }
  0xc7   : > { %1151 = vrot.lane.b32.xlu1 %v4286_v23, %s4025_s4  ;;  %736 = vst.msk [vmem:[#allocation3 + $0x40] sm:$0xf] %vm719_vm3, %v656_v34  ;;  %v1273_v34 = vld [vmem:[#allocation2 + $0x69] sm:$0xff] }
  0xc8   : > { %1157 = vrot.lane.b32.xlu0 %v4296_v32, %s4025_s4 }
  0xc9   : > { %v654_v38 = vpop.permute.xlu1 %653 }
  0xca   : > { %735 = vst.msk [vmem:[#allocation3 + $0x3c] sm:$0xf] %vm719_vm3, %v654_v38  ;;  %v660_v44 = vpop.permute.xlu0 %659 }
  0xcb   : > { %1155 = vrot.lane.b32.xlu1 %v4294_v29, %s4025_s4  ;;  %738 = vst.msk [vmem:[#allocation3 + $0x48] sm:$0xf] %vm719_vm3, %v660_v44 }
  0xcc   : > { %1161 = vrot.lane.b32.xlu0 %v4309_v41, %s4025_s4 }
  0xcd   : > { %v658_v46 = vpop.permute.xlu1 %657 }
  0xce   : > { %737 = vst.msk [vmem:[#allocation3 + $0x44] sm:$0xf] %vm719_vm3, %v658_v46  ;;  %v664_v51 = vpop.permute.xlu0 %663 }
  0xcf   : > { %1159 = vrot.lane.b32.xlu1 %v4298_v33, %s4025_s4  ;;  %740 = vst.msk [vmem:[#allocation3 + $0x50] sm:$0xf] %vm719_vm3, %v664_v51 }
  0xd0   : > { %1165 = vrot.lane.b32.xlu0 %v4313_v43, %s4025_s4 }
  0xd1   : > { %v662_v52 = vpop.permute.xlu1 %661 }
  0xd2   : > { %739 = vst.msk [vmem:[#allocation3 + $0x4c] sm:$0xf] %vm719_vm3, %v662_v52  ;;  %v668_v54 = vpop.permute.xlu0 %667 }
  0xd3   : > { %1163 = vrot.lane.b32.xlu1 %v4311_v42, %s4025_s4  ;;  %742 = vst.msk [vmem:[#allocation3 + $0x58] sm:$0xf] %vm719_vm3, %v668_v54 }
  0xd4   : > { %1169 = vrot.lane.b32.xlu0 %v4323_v48, %s4025_s4 }
  0xd5   : > { %v666_v57 = vpop.permute.xlu1 %665 }
  0xd6   : > { %741 = vst.msk [vmem:[#allocation3 + $0x54] sm:$0xf] %vm719_vm3, %v666_v57  ;;  %v672_v58 = vpop.permute.xlu0 %671 }
  0xd7   : > { %1167 = vrot.lane.b32.xlu1 %v4321_v47, %s4025_s4  ;;  %744 = vst.msk [vmem:[#allocation3 + $0x60] sm:$0xf] %vm719_vm3, %v672_v58 }
  0xd8   : > { %1394 = vrot.lane.b32.xlu0 %v4210_v30, %s4026_s5 }
  0xd9   : > { %v670_v59 = vpop.permute.xlu1 %669 }
  0xda   : > { %743 = vst.msk [vmem:[#allocation3 + $0x5c] sm:$0xf] %vm719_vm3, %v670_v59  ;;  %v676_v60 = vpop.permute.xlu0 %675 }
  0xdb   : > { %1171 = vrot.lane.b32.xlu1 %v4325_v50, %s4025_s4  ;;  %746 = vst.msk [vmem:[#allocation3 + $0x68] sm:$0xf] %vm719_vm3, %v676_v60 }
  0xdc   : > { %1398 = vrot.lane.b32.xlu0 %v4213_v31, %s4026_s5 }
  0xdd   : > { %v674_v61 = vpop.permute.xlu1 %673 }
  0xde   : > { %745 = vst.msk [vmem:[#allocation3 + $0x64] sm:$0xf] %vm719_vm3, %v674_v61  ;;  %v680_v62 = vpop.permute.xlu0 %679 }
  0xdf   : > { %1396 = vrot.lane.b32.xlu1 %v4219_v35, %s4026_s5  ;;  %748 = vst.msk [vmem:[#allocation3 + $0x70] sm:$0xf] %vm719_vm3, %v680_v62 }
  0xe0   : > { %1651 = vrot.lane.b32.xlu0 %v4375_v4, %s4027_s6 }
  0xe1   : > { %v678_v30 = vpop.permute.xlu1 %677 }
  0xe2   : > { %747 = vst.msk [vmem:[#allocation3 + $0x6c] sm:$0xf] %vm719_vm3, %v678_v30  ;;  %v684_v63 = vpop.permute.xlu0 %683 }
  0xe3   : > { %1400 = vrot.lane.b32.xlu1 %v4229_v39, %s4026_s5  ;;  %750 = vst.msk [vmem:[#allocation3 + $0x78] sm:$0xf] %vm719_vm3, %v684_v63 }
  0xe4   : > { %1655 = vrot.lane.b32.xlu0 %v4380_v9, %s4027_s6 }
  0xe5   : > { %v682_v1 = vpop.permute.xlu1 %681 }
  0xe6   : > { %749 = vst.msk [vmem:[#allocation3 + $0x74] sm:$0xf] %vm719_vm3, %v682_v1  ;;  %v881_v35 = vpop.permute.xlu0 %880 }
  0xe7   : > { %1653 = vrot.lane.b32.xlu1 %v4383_v13, %s4027_s6  ;;  %977 = vst.msk [vmem:[#allocation3] sm:$0xf] %vm976_vm4, %v881_v35  ;;  %v1276_v35 = vld [vmem:[#allocation2 + $0x91] sm:$0xff] }
  0xe8   : > { %1909 = vrot.lane.b32.xlu0 %v4267_v11, %s4028_s7 }
  0xe9   : > { %v686_v4 = vpop.permute.xlu1 %685 }
  0xea   : > { %751 = vst.msk [vmem:[#allocation3 + $0x7c] sm:$0xf] %vm719_vm3, %v686_v4  ;;  %v885_v2 = vpop.permute.xlu0 %884 }
  0xeb   : > { %1657 = vrot.lane.b32.xlu1 %v4391_v19, %s4027_s6  ;;  %979 = vst.msk [vmem:[#allocation3 + $0x8] sm:$0xf] %vm976_vm4, %v885_v2  ;;  %v3641_v2 = vpack.c.bf16 %v1276_v35, %v1276_v35 }
  0xec   : > { %1913 = vrot.lane.b32.xlu0 %v4275_v16, %s4028_s7 }
  0xed   : > { %v883_v3 = vpop.permute.xlu1 %882 }
  0xee   : > { %978 = vst.msk [vmem:[#allocation3 + $0x4] sm:$0xf] %vm976_vm4, %v883_v3  ;;  %v889_v13 = vpop.permute.xlu0 %888 }
  0xef   : > { %1911 = vrot.lane.b32.xlu1 %v4269_v12, %s4028_s7  ;;  %981 = vst.msk [vmem:[#allocation3 + $0x10] sm:$0xf] %vm976_vm4, %v889_v13  ;;  %v2735_v12 = vsel %vm2733_vm5, %v3911_v5, 0  ;;  %v1277_v13 = vld [vmem:[#allocation2 + $0x99] sm:$0xff] }
  0xf0   : > { %2166 = vrot.lane.b32.xlu0 %v4213_v31, %s4029_s8  ;;  %3812 = vmatpush3.bf16.msra.mxu0 %v2735_v12  ;;  %v3912_v31 = vld [vmem:[%s5091_s1 + $0x8] sm:$0xff]  }
  0xf1   : > { %v887_v11 = vpop.permute.xlu1 %886  ;;  %3852 = vmatpush3.bf16.msra.mxu1 %v2735_v12  ;;  %3813 = vmatprep.subr.bf16.mxu0 %v3912_v31 }
  0xf2   : > { %980 = vst.msk [vmem:[#allocation3 + $0xc] sm:$0xf] %vm976_vm4, %v887_v11  ;;  %v893_v16 = vpop.permute.xlu0 %892  ;;  %3850 = vmatprep.subr.bf16.mxu1 %v3912_v31 }
  0xf3   : > { %1915 = vrot.lane.b32.xlu1 %v4277_v17, %s4028_s7  ;;  %983 = vst.msk [vmem:[#allocation3 + $0x18] sm:$0xf] %vm976_vm4, %v893_v16 }
  0xf4   : > { %2170 = vrot.lane.b32.xlu0 %v4225_v37, %s4029_s8  ;;  %3814 = vmatpush3.bf16.msra.mxu0 %v3912_v31  ;;  %v3913_v37 = vld [vmem:[%s5091_s1] sm:$0xff]  }
  0xf5   : > { %v891_v7 = vpop.permute.xlu1 %890  ;;  %3853 = vmatpush3.bf16.msra.mxu1 %v3912_v31  ;;  %3815 = vmatprep.subr.bf16.mxu0 %v3913_v37 }
  0xf6   : > { %982 = vst.msk [vmem:[#allocation3 + $0x14] sm:$0xf] %vm976_vm4, %v891_v7  ;;  %v897_v17 = vpop.permute.xlu0 %896  ;;  %3851 = vmatprep.subr.bf16.mxu1 %v3913_v37 }
  0xf7   : > { %2168 = vrot.lane.b32.xlu1 %v4229_v39, %s4029_s8  ;;  %985 = vst.msk [vmem:[#allocation3 + $0x20] sm:$0xf] %vm976_vm4, %v897_v17 }
  0xf8   : > { %2423 = vrot.lane.b32.xlu0 %v4380_v9, %s4030_s19  ;;  %3816 = vmatpush3.bf16.msra.mxu0 %v3913_v37  ;;  %v3635_v9 = vpack.c.bf16 %v1270_v10, %v1270_v10  ;;  %v2049_v10 = vld [vmem:[#allocation2 + $0xb1] sm:$0xff] }
  0xf9   : > { %v895_v8 = vpop.permute.xlu1 %894  ;;  %3854 = vmatpush3.bf16.msra.mxu1 %v3913_v37  ;;  %v2303_v37 = vld [vmem:[#allocation2 + $0x92] sm:$0xff] }
  0xfa   : > { %984 = vst.msk [vmem:[#allocation3 + $0x1c] sm:$0xf] %vm976_vm4, %v895_v8  ;;  %v901_v39 = vpop.permute.xlu0 %900 }
  0xfb   : > { %2172 = vrot.lane.b32.xlu1 %v4247_v49, %s4029_s8  ;;  %987 = vst.msk [vmem:[#allocation3 + $0x28] sm:$0xf] %vm976_vm4, %v901_v39  ;;  %v1271_v49 = vld [vmem:[#allocation2 + $0x51] sm:$0xff] }
  0xfc   : > { %2427 = vrot.lane.b32.xlu0 %v4387_v15, %s4030_s19  ;;  %v3636_v6 = vpack.c.bf16 %v1271_v49, %v1271_v49 }
  0xfd   : > { %v899_v14 = vpop.permute.xlu1 %898 }
  0xfe   : > { %986 = vst.msk [vmem:[#allocation3 + $0x24] sm:$0xf] %vm976_vm4, %v899_v14  ;;  %v905_v0 = vpop.permute.xlu0 %904  ;;  %v2305_v14 = vld [vmem:[#allocation2 + $0xaa] sm:$0xff] }
  0xff   : > { %2425 = vrot.lane.b32.xlu1 %v4391_v19, %s4030_s19  ;;  %989 = vst.msk [vmem:[#allocation3 + $0x30] sm:$0xf] %vm976_vm4, %v905_v0  ;;  %v3638_v19 = vpack.c.bf16 %v1273_v34, %v1273_v34  ;;  %v2304_v0 = vld [vmem:[#allocation2 + $0x9a] sm:$0xff] }
 0x100   : > { %1402 = vrot.lane.b32.xlu0 %v3635_v9, %s4026_s5  ;;  %v3738_v9 = vpack.c.bf16 %v2049_v10, %v2049_v10  ;;  %v1280_v34 = vld [vmem:[#allocation2 + $0xc1] sm:$0xff] }
 0x101   : > { %v903_v20 = vpop.permute.xlu1 %902 }
 0x102   : > { %988 = vst.msk [vmem:[#allocation3 + $0x2c] sm:$0xf] %vm976_vm4, %v903_v20  ;;  %v909_v27 = vpop.permute.xlu0 %908  ;;  %v3768_v20 = vpack.c.bf16 %v2304_v0, %v2304_v0  ;;  %v1542_v0 = vld [vmem:[#allocation2 + $0xfa] sm:$0xff] }
 0x103   : > { %2429 = vrot.lane.b32.xlu1 %v4399_v26, %s4030_s19  ;;  %991 = vst.msk [vmem:[#allocation3 + $0x38] sm:$0xf] %vm976_vm4, %v909_v27 }
 0x104   : > { %1406 = vrot.lane.b32.xlu0 %v3637_v25, %s4026_s5 }
 0x105   : > { %v907_v38 = vpop.permute.xlu1 %906 }
 0x106   : > { %990 = vst.msk [vmem:[#allocation3 + $0x34] sm:$0xf] %vm976_vm4, %v907_v38  ;;  %v913_v44 = vpop.permute.xlu0 %912 }
 0x107   : > { %1404 = vrot.lane.b32.xlu1 %v3636_v6, %s4026_s5  ;;  %993 = vst.msk [vmem:[#allocation3 + $0x40] sm:$0xf] %vm976_vm4, %v913_v44  ;;  %v2306_v6 = vld [vmem:[#allocation2 + $0xb2] sm:$0xff] }
 0x108   : > { %1659 = vrot.lane.b32.xlu0 %v4387_v15, %s4027_s6  ;;  %v3770_v38 = vpack.c.bf16 %v2306_v6, %v2306_v6 }
 0x109   : > { %v911_v46 = vpop.permute.xlu1 %910 }
 0x10a   : > { %992 = vst.msk [vmem:[#allocation3 + $0x3c] sm:$0xf] %vm976_vm4, %v911_v46  ;;  %v917_v51 = vpop.permute.xlu0 %916  ;;  %v3645_v46 = vpack.c.bf16 %v1280_v34, %v1280_v34 }
 0x10b   : > { %1408 = vrot.lane.b32.xlu1 %v3638_v19, %s4026_s5  ;;  %995 = vst.msk [vmem:[#allocation3 + $0x48] sm:$0xf] %vm976_vm4, %v917_v51 }
 0x10c   : > { %1663 = vrot.lane.b32.xlu0 %v4395_v21, %s4027_s6 }
 0x10d   : > { %v915_v52 = vpop.permute.xlu1 %914 }
 0x10e   : > { %994 = vst.msk [vmem:[#allocation3 + $0x44] sm:$0xf] %vm976_vm4, %v915_v52  ;;  %v921_v54 = vpop.permute.xlu0 %920  ;;  %v1281_v52 = vld [vmem:[#allocation2 + $0xc9] sm:$0xff] }
 0x10f   : > { %1661 = vrot.lane.b32.xlu1 %v4399_v26, %s4027_s6  ;;  %997 = vst.msk [vmem:[#allocation3 + $0x50] sm:$0xf] %vm976_vm4, %v921_v54  ;;  %v2044_v26 = vld [vmem:[#allocation2 + $0x79] sm:$0xff] }
 0x110   : > { %1917 = vrot.lane.b32.xlu0 %v4284_v22, %s4028_s7  ;;  %v3733_v60 = vpack.c.bf16 %v2044_v26, %v2044_v26 }
 0x111   : > { %v919_v15 = vpop.permute.xlu1 %918 }
 0x112   : > { %996 = vst.msk [vmem:[#allocation3 + $0x4c] sm:$0xf] %vm976_vm4, %v919_v15  ;;  %v925_v57 = vpop.permute.xlu0 %924  ;;  %v1537_v15 = vld [vmem:[#allocation2 + $0xc2] sm:$0xff] }
 0x113   : > { %1665 = vrot.lane.b32.xlu1 %v4407_v36, %s4027_s6  ;;  %999 = vst.msk [vmem:[#allocation3 + $0x58] sm:$0xf] %vm976_vm4, %v925_v57  ;;  %v3646_v57 = vpack.c.bf16 %v1281_v52, %v1281_v52  ;;  %v2056_v52 = vld [vmem:[#allocation2 + $0x109] sm:$0xff] }
 0x114   : > { %1921 = vrot.lane.b32.xlu0 %v4288_v24, %s4028_s7  ;;  %v2045_v24 = vld [vmem:[#allocation2 + $0x81] sm:$0xff] }
 0x115   : > { %v923_v58 = vpop.permute.xlu1 %922 }
 0x116   : > { %998 = vst.msk [vmem:[#allocation3 + $0x54] sm:$0xf] %vm976_vm4, %v923_v58  ;;  %v929_v59 = vpop.permute.xlu0 %928 }
 0x117   : > { %1919 = vrot.lane.b32.xlu1 %v4286_v23, %s4028_s7  ;;  %1001 = vst.msk [vmem:[#allocation3 + $0x60] sm:$0xf] %vm976_vm4, %v929_v59  ;;  %v3734_v23 = vpack.c.bf16 %v2045_v24, %v2045_v24  ;;  %v3677_v59 = vpack.c.bf16 %v1537_v15, %v1537_v15 }
 0x118   : > { %2174 = vrot.lane.b32.xlu0 %v3637_v25, %s4029_s8 }
 0x119   : > { %v927_v22 = vpop.permute.xlu1 %926 }
 0x11a   : > { %1000 = vst.msk [vmem:[#allocation3 + $0x5c] sm:$0xf] %vm976_vm4, %v927_v22  ;;  %v933_v61 = vpop.permute.xlu0 %932 }
 0x11b   : > { %1923 = vrot.lane.b32.xlu1 %v4294_v29, %s4028_s7  ;;  %1003 = vst.msk [vmem:[#allocation3 + $0x68] sm:$0xf] %vm976_vm4, %v933_v61 }
 0x11c   : > { %2178 = vrot.lane.b32.xlu0 %v3733_v60, %s4029_s8 }
 0x11d   : > { %v931_v62 = vpop.permute.xlu1 %930 }
 0x11e   : > { %1002 = vst.msk [vmem:[#allocation3 + $0x64] sm:$0xf] %vm976_vm4, %v931_v62  ;;  %v937_v30 = vpop.permute.xlu0 %936 }
 0x11f   : > { %2176 = vrot.lane.b32.xlu1 %v3638_v19, %s4029_s8  ;;  %1005 = vst.msk [vmem:[#allocation3 + $0x70] sm:$0xf] %vm976_vm4, %v937_v30 }
 0x120   : > { %2431 = vrot.lane.b32.xlu0 %v4395_v21, %s4030_s19 }
 0x121   : > { %v935_v63 = vpop.permute.xlu1 %934 }
 0x122   : > { %1004 = vst.msk [vmem:[#allocation3 + $0x6c] sm:$0xf] %vm976_vm4, %v935_v63  ;;  %v941_v29 = vpop.permute.xlu0 %940 }
 0x123   : > { %2180 = vrot.lane.b32.xlu1 %v3734_v23, %s4029_s8  ;;  %1007 = vst.msk [vmem:[#allocation3 + $0x78] sm:$0xf] %vm976_vm4, %v941_v29  ;;  %v2052_v29 = vld [vmem:[#allocation2 + $0xd9] sm:$0xff] }
 0x124   : > { %2435 = vrot.lane.b32.xlu0 %v4403_v28, %s4030_s19  ;;  %v3741_v35 = vpack.c.bf16 %v2052_v29, %v2052_v29 }
 0x125   : > { %v939_v1 = vpop.permute.xlu1 %938 }
 0x126   : > { %1006 = vst.msk [vmem:[#allocation3 + $0x74] sm:$0xf] %vm976_vm4, %v939_v1  ;;  %v1138_v4 = vpop.permute.xlu0 %1137 }
 0x127   : > { %2433 = vrot.lane.b32.xlu1 %v4407_v36, %s4030_s19  ;;  %1234 = vst.msk [vmem:[#allocation3] sm:$0xf] %vm1233_vm6, %v1138_v4  ;;  %v3642_v36 = vpack.c.bf16 %v1277_v13, %v1277_v13  ;;  %v2053_v4 = vld [vmem:[#allocation2 + $0xe1] sm:$0xff] }
 0x128   : > { %1410 = vrot.lane.b32.xlu0 %v3733_v60, %s4026_s5  ;;  %v1538_v60 = vld [vmem:[#allocation2 + $0xca] sm:$0xff] }
 0x129   : > { %v943_v21 = vpop.permute.xlu1 %942  ;;  %v3678_v24 = vpack.c.bf16 %v1538_v60, %v1538_v60  ;;  %v2313_v60 = vld [vmem:[#allocation2 + $0x10a] sm:$0xff] }
 0x12a   : > { %1008 = vst.msk [vmem:[#allocation3 + $0x7c] sm:$0xf] %vm976_vm4, %v943_v21  ;;  %v1142_v3 = vpop.permute.xlu0 %1141 }
 0x12b   : > { %2437 = vrot.lane.b32.xlu1 %v4415_v45, %s4030_s19  ;;  %1236 = vst.msk [vmem:[#allocation3 + $0x8] sm:$0xf] %vm1233_vm6, %v1142_v3 }
 0x12c   : > { %1414 = vrot.lane.b32.xlu0 %v3641_v2, %s4026_s5 }
 0x12d   : > { %v1140_v11 = vpop.permute.xlu1 %1139 }
 0x12e   : > { %1235 = vst.msk [vmem:[#allocation3 + $0x4] sm:$0xf] %vm1233_vm6, %v1140_v11  ;;  %v1146_v5 = vpop.permute.xlu0 %1145 }
 0x12f   : > { %1412 = vrot.lane.b32.xlu1 %v3734_v23, %s4026_s5  ;;  %1238 = vst.msk [vmem:[#allocation3 + $0x10] sm:$0xf] %vm1233_vm6, %v1146_v5 }
 0x130   : > { %1667 = vrot.lane.b32.xlu0 %v4403_v28, %s4027_s6 }
 0x131   : > { %v1144_v16 = vpop.permute.xlu1 %1143 }
 0x132   : > { %1237 = vst.msk [vmem:[#allocation3 + $0xc] sm:$0xf] %vm1233_vm6, %v1144_v16  ;;  %v1150_v12 = vpop.permute.xlu0 %1149 }
 0x133   : > { %1416 = vrot.lane.b32.xlu1 %v3642_v36, %s4026_s5  ;;  %1240 = vst.msk [vmem:[#allocation3 + $0x18] sm:$0xf] %vm1233_vm6, %v1150_v12 }
 0x134   : > { %1671 = vrot.lane.b32.xlu0 %v4411_v40, %s4027_s6 }
 0x135   : > { %v1148_v7 = vpop.permute.xlu1 %1147 }
 0x136   : > { %1239 = vst.msk [vmem:[#allocation3 + $0x14] sm:$0xf] %vm1233_vm6, %v1148_v7  ;;  %v1154_v31 = vpop.permute.xlu0 %1153 }
 0x137   : > { %1669 = vrot.lane.b32.xlu1 %v4415_v45, %s4027_s6  ;;  %1242 = vst.msk [vmem:[#allocation3 + $0x20] sm:$0xf] %vm1233_vm6, %v1154_v31  ;;  %v2048_v45 = vld [vmem:[#allocation2 + $0xa9] sm:$0xff] }
 0x138   : > { %1925 = vrot.lane.b32.xlu0 %v4296_v32, %s4028_s7 }
 0x139   : > { %v1152_v28 = vpop.permute.xlu1 %1151 }
 0x13a   : > { %1241 = vst.msk [vmem:[#allocation3 + $0x1c] sm:$0xf] %vm1233_vm6, %v1152_v28  ;;  %v1158_v17 = vpop.permute.xlu0 %1157  ;;  %v1284_v28 = vld [vmem:[#allocation2 + $0xf1] sm:$0xff] }
 0x13b   : > { %1673 = vrot.lane.b32.xlu1 %v4421_v53, %s4027_s6  ;;  %1244 = vst.msk [vmem:[#allocation3 + $0x28] sm:$0xf] %vm1233_vm6, %v1158_v17  ;;  %v3737_v53 = vpack.c.bf16 %v2048_v45, %v2048_v45 }
 0x13c   : > { %1929 = vrot.lane.b32.xlu0 %v4309_v41, %s4028_s7 }
 0x13d   : > { %v1156_v40 = vpop.permute.xlu1 %1155 }
 0x13e   : > { %1243 = vst.msk [vmem:[#allocation3 + $0x24] sm:$0xf] %vm1233_vm6, %v1156_v40  ;;  %v1162_v8 = vpop.permute.xlu0 %1161 }
 0x13f   : > { %1927 = vrot.lane.b32.xlu1 %v4298_v33, %s4028_s7  ;;  %1246 = vst.msk [vmem:[#allocation3 + $0x30] sm:$0xf] %vm1233_vm6, %v1162_v8  ;;  %v3767_v33 = vpack.c.bf16 %v2303_v37, %v2303_v37  ;;  %v3649_v8 = vpack.c.bf16 %v1284_v28, %v1284_v28  ;;  %v1541_v37 = vld [vmem:[#allocation2 + $0xf2] sm:$0xff]  ;;  %v1545_v28 = vld [vmem:[#allocation2 + $0x122] sm:$0xff] }
 0x140   : > { %2182 = vrot.lane.b32.xlu0 %v3641_v2, %s4029_s8  ;;  %v3742_v2 = vpack.c.bf16 %v2053_v4, %v2053_v4 }
 0x141   : > { %v1160_v32 = vpop.permute.xlu1 %1159 }
 0x142   : > { %1245 = vst.msk [vmem:[#allocation3 + $0x2c] sm:$0xf] %vm1233_vm6, %v1160_v32  ;;  %v1166_v41 = vpop.permute.xlu0 %1165  ;;  %v1285_v32 = vld [vmem:[#allocation2 + $0xf9] sm:$0xff] }
 0x143   : > { %1931 = vrot.lane.b32.xlu1 %v4311_v42, %s4028_s7  ;;  %1248 = vst.msk [vmem:[#allocation3 + $0x38] sm:$0xf] %vm1233_vm6, %v1166_v41  ;;  %v3769_v42 = vpack.c.bf16 %v2305_v14, %v2305_v14  ;;  %v3650_v41 = vpack.c.bf16 %v1285_v32, %v1285_v32  ;;  %v212_v14 = vld [vmem:[%s4163_s28 + $0xf8] sm:$0xff]  ;;  %v1546_v32 = vld [vmem:[#allocation2 + $0x12a] sm:$0xff] }
 0x144   : > { %2186 = vrot.lane.b32.xlu0 %v3737_v53, %s4029_s8  ;;  %301 = vst.msk [vmem:[#allocation2 + $0x189] sm:$0xff] %vm213_vm0, %v212_v14  ;;  %v1804_v14 = vld [vmem:[#allocation2 + $0x140] sm:$0xff] }
 0x145   : > { %v1164_v39 = vpop.permute.xlu1 %1163 }
 0x146   : > { %1247 = vst.msk [vmem:[#allocation3 + $0x34] sm:$0xf] %vm1233_vm6, %v1164_v39  ;;  %v1170_v18 = vpop.permute.xlu0 %1169 }
 0x147   : > { %2184 = vrot.lane.b32.xlu1 %v3642_v36, %s4029_s8  ;;  %1250 = vst.msk [vmem:[#allocation3 + $0x40] sm:$0xf] %vm1233_vm6, %v1170_v18  ;;  %v2310_v36 = vld [vmem:[#allocation2 + $0xe2] sm:$0xff] }
 0x148   : > { %2439 = vrot.lane.b32.xlu0 %v3767_v33, %s4030_s19  ;;  %v3774_v16 = vpack.c.bf16 %v2310_v36, %v2310_v36  ;;  %v3681_v33 = vpack.c.bf16 %v1541_v37, %v1541_v37  ;;  %v1803_v37 = vld [vmem:[#allocation2 + $0x138] sm:$0xff] }
 0x149   : > { %v1168_v49 = vpop.permute.xlu1 %1167 }
 0x14a   : > { %1249 = vst.msk [vmem:[#allocation3 + $0x3c] sm:$0xf] %vm1233_vm6, %v1168_v49  ;;  %v1395_v25 = vpop.permute.xlu0 %1394 }
 0x14b   : > { %2188 = vrot.lane.b32.xlu1 %v3738_v9, %s4029_s8  ;;  %1491 = vst.msk [vmem:[#allocation3] sm:$0xf] %vm1490_vm7, %v1395_v25  ;;  %v3682_v25 = vpack.c.bf16 %v1542_v0, %v1542_v0  ;;  %v3718_v0 = vpack.c.bf16 %v1804_v14, %v1804_v14 }
 0x14c   : > { %2443 = vrot.lane.b32.xlu0 %v3769_v42, %s4030_s19 }
 0x14d   : > { %v1172_v27 = vpop.permute.xlu1 %1171 }
 0x14e   : > { %1251 = vst.msk [vmem:[#allocation3 + $0x44] sm:$0xf] %vm1233_vm6, %v1172_v27  ;;  %v1399_v19 = vpop.permute.xlu0 %1398  ;;  %v1798_v27 = vld [vmem:[#allocation2 + $0xf8] sm:$0xff] }
 0x14f   : > { %2441 = vrot.lane.b32.xlu1 %v3768_v20, %s4030_s19  ;;  %1493 = vst.msk [vmem:[#allocation3 + $0x8] sm:$0xf] %vm1490_vm7, %v1399_v19  ;;  %v1799_v20 = vld [vmem:[#allocation2 + $0x108] sm:$0xff]  ;;  %v3712_v19 = vpack.c.bf16 %v1798_v27, %v1798_v27 }
 0x150   : > { %1418 = vrot.lane.b32.xlu0 %v3737_v53, %s4026_s5 }
 0x151   : > { %v1397_v44 = vpop.permute.xlu1 %1396 }
 0x152   : > { %1492 = vst.msk [vmem:[#allocation3 + $0x4] sm:$0xf] %vm1490_vm7, %v1397_v44  ;;  %v1652_v51 = vpop.permute.xlu0 %1651 }
 0x153   : > { %2445 = vrot.lane.b32.xlu1 %v3770_v38, %s4030_s19  ;;  %1748 = vst.msk [vmem:[#allocation3] sm:$0xf] %vm1747_vm8, %v1652_v51 }
 0x154   : > { %1422 = vrot.lane.b32.xlu0 %v3645_v46, %s4026_s5 }
 0x155   : > { %v1401_v54 = vpop.permute.xlu1 %1400 }
 0x156   : > { %1494 = vst.msk [vmem:[#allocation3 + $0xc] sm:$0xf] %vm1490_vm7, %v1401_v54  ;;  %v1656_v58 = vpop.permute.xlu0 %1655 }
 0x157   : > { %1420 = vrot.lane.b32.xlu1 %v3738_v9, %s4026_s5  ;;  %1750 = vst.msk [vmem:[#allocation3 + $0x8] sm:$0xf] %vm1747_vm8, %v1656_v58  ;;  %v1797_v9 = vld [vmem:[#allocation2 + $0xf0] sm:$0xff]  ;;  %v3745_v58 = vpack.c.bf16 %v2056_v52, %v2056_v52 }
 0x158   : > { %1675 = vrot.lane.b32.xlu0 %v3769_v42, %s4027_s6  ;;  %v3711_v42 = vpack.c.bf16 %v1797_v9, %v1797_v9 }
 0x159   : > { %v1654_v26 = vpop.permute.xlu1 %1653 }
 0x15a   : > { %1749 = vst.msk [vmem:[#allocation3 + $0x4] sm:$0xf] %vm1747_vm8, %v1654_v26  ;;  %v1910_v22 = vpop.permute.xlu0 %1909 }
 0x15b   : > { %1424 = vrot.lane.b32.xlu1 %v3646_v57, %s4026_s5  ;;  %2006 = vst.msk [vmem:[#allocation3] sm:$0xf] %vm2005_vm9, %v1910_v22 }
 0x15c   : > { %1679 = vrot.lane.b32.xlu0 %v3677_v59, %s4027_s6 }
 0x15d   : > { %v1658_v61 = vpop.permute.xlu1 %1657 }
 0x15e   : > { %1751 = vst.msk [vmem:[#allocation3 + $0xc] sm:$0xf] %vm1747_vm8, %v1658_v61  ;;  %v1914_v62 = vpop.permute.xlu0 %1913 }
 0x15f   : > { %1677 = vrot.lane.b32.xlu1 %v3770_v38, %s4027_s6  ;;  %2008 = vst.msk [vmem:[#allocation3 + $0x8] sm:$0xf] %vm2005_vm9, %v1914_v62  ;;  %v3713_v38 = vpack.c.bf16 %v1799_v20, %v1799_v20 }
 0x160   : > { %1933 = vrot.lane.b32.xlu0 %v4313_v43, %s4028_s7 }
 0x161   : > { %v1912_v23 = vpop.permute.xlu1 %1911 }
 0x162   : > { %2007 = vst.msk [vmem:[#allocation3 + $0x4] sm:$0xf] %vm2005_vm9, %v1912_v23  ;;  %v2167_v30 = vpop.permute.xlu0 %2166  ;;  %v3777_v23 = vpack.c.bf16 %v2313_v60, %v2313_v60 }
 0x163   : > { %1681 = vrot.lane.b32.xlu1 %v3678_v24, %s4027_s6  ;;  %2263 = vst.msk [vmem:[#allocation3] sm:$0xf] %vm2262_vm10, %v2167_v30 }
 0x164   : > { %1937 = vrot.lane.b32.xlu0 %v4323_v48, %s4028_s7 }
 0x165   : > { %v1916_v63 = vpop.permute.xlu1 %1915 }
 0x166   : > { %2009 = vst.msk [vmem:[#allocation3 + $0xc] sm:$0xf] %vm2005_vm9, %v1916_v63  ;;  %v2171_v1 = vpop.permute.xlu0 %2170  ;;  %v2314_v63 = vld [vmem:[#allocation2 + $0x112] sm:$0xff] }
 0x167   : > { %1935 = vrot.lane.b32.xlu1 %v4321_v47, %s4028_s7  ;;  %2265 = vst.msk [vmem:[#allocation3 + $0x8] sm:$0xf] %vm2262_vm10, %v2171_v1  ;;  %v2309_v47 = vld [vmem:[#allocation2 + $0xda] sm:$0xff] }
 0x168   : > { %2190 = vrot.lane.b32.xlu0 %v3645_v46, %s4029_s8  ;;  %v1800_v46 = vld [vmem:[#allocation2 + $0x110] sm:$0xff] }
 0x169   : > { %v2169_v43 = vpop.permute.xlu1 %2168  ;;  %v3714_v54 = vpack.c.bf16 %v1800_v46, %v1800_v46 }
 0x16a   : > { %2264 = vst.msk [vmem:[#allocation3 + $0x4] sm:$0xf] %vm2262_vm10, %v2169_v43  ;;  %v2424_v48 = vpop.permute.xlu0 %2423  ;;  %v1031_v43 = vld [vmem:[#allocation2 + $0x120] sm:$0xff] }
 0x16b   : > { %1939 = vrot.lane.b32.xlu1 %v4325_v50, %s4028_s7  ;;  %2520 = vst.msk [vmem:[#allocation3] sm:$0xf] %vm2519_vm11, %v2424_v48  ;;  %v3773_v50 = vpack.c.bf16 %v2309_v47, %v2309_v47  ;;  %v3621_v47 = vpack.c.bf16 %v1031_v43, %v1031_v43 }
 0x16c   : > { %2194 = vrot.lane.b32.xlu0 %v3741_v35, %s4029_s8 }
 0x16d   : > { %v2173_v21 = vpop.permute.xlu1 %2172 }
 0x16e   : > { %2266 = vst.msk [vmem:[#allocation3 + $0xc] sm:$0xf] %vm2262_vm10, %v2173_v21  ;;  %v2428_v3 = vpop.permute.xlu0 %2427 }
 0x16f   : > { %2192 = vrot.lane.b32.xlu1 %v3646_v57, %s4029_s8  ;;  %2522 = vst.msk [vmem:[#allocation3 + $0x8] sm:$0xf] %vm2519_vm11, %v2428_v3  ;;  %v1032_v3 = vld [vmem:[#allocation2 + $0x128] sm:$0xff] }
 0x170   : > { %2447 = vrot.lane.b32.xlu0 %v3677_v59, %s4030_s19  ;;  %v2057_v59 = vld [vmem:[#allocation2 + $0x111] sm:$0xff] }
 0x171   : > { %v2426_v13 = vpop.permute.xlu1 %2425  ;;  %v3746_v61 = vpack.c.bf16 %v2057_v59, %v2057_v59 }
 0x172   : > { %2521 = vst.msk [vmem:[#allocation3 + $0x4] sm:$0xf] %vm2519_vm11, %v2426_v13  ;;  %v1403_v11 = vpop.permute.xlu0 %1402 }
 0x173   : > { %2196 = vrot.lane.b32.xlu1 %v3742_v2, %s4029_s8  ;;  %1495 = vst.msk [vmem:[#allocation3 + $0x10] sm:$0xf] %vm1490_vm7, %v1403_v11  ;;  %v3622_v11 = vpack.c.bf16 %v1032_v3, %v1032_v3 }
 0x174   : > { %2451 = vrot.lane.b32.xlu0 %v3773_v50, %s4030_s19 }
 0x175   : > { %v2430_v5 = vpop.permute.xlu1 %2429 }
 0x176   : > { %2523 = vst.msk [vmem:[#allocation3 + $0xc] sm:$0xf] %vm2519_vm11, %v2430_v5  ;;  %v1407_v12 = vpop.permute.xlu0 %1406 }
 0x177   : > { %2449 = vrot.lane.b32.xlu1 %v3678_v24, %s4030_s19  ;;  %1497 = vst.msk [vmem:[#allocation3 + $0x18] sm:$0xf] %vm1490_vm7, %v1407_v12 }
 0x178   : > { %1173 = vrot.lane.b32.xlu0 %v4336_v55, %s4025_s4 }
 0x179   : > { %v1405_v7 = vpop.permute.xlu1 %1404  ;;  %v3914_v31 = vld [vmem:[#allocation3] sm:$0xff]  }
 0x17a   : > { %1496 = vst.msk [vmem:[#allocation3 + $0x14] sm:$0xf] %vm1490_vm7, %v1405_v7  ;;  %3817 = vmatprep.mubr.msk.bf16.mxu0 %vm2684_vm12, %v3914_v31  ;;  %v1660_v17 = vpop.permute.xlu0 %1659  ;;  %v1289_v7 = vld [vmem:[#allocation2 + $0x129] sm:$0xff] }
 0x17b   : > { %2453 = vrot.lane.b32.xlu1 %v3774_v16, %s4030_s19  ;;  %1752 = vst.msk [vmem:[#allocation3 + $0x10] sm:$0xf] %vm1747_vm8, %v1660_v17  ;;  %v3654_v17 = vpack.c.bf16 %v1289_v7, %v1289_v7 }
 0x17c   : > { %1426 = vrot.lane.b32.xlu0 %v3741_v35, %s4026_s5  ;;  %v3778_v35 = vpack.c.bf16 %v2314_v63, %v2314_v63 }
 0x17d   : > { %v1409_v40 = vpop.permute.xlu1 %1408  ;;  %v3915_v45 = vld [vmem:[#allocation3 + $0x8] sm:$0xff]  }
 0x17e   : > { %1498 = vst.msk [vmem:[#allocation3 + $0x1c] sm:$0xf] %vm1490_vm7, %v1409_v40  ;;  %3818 = vmatmul.mubr.msk.bf16.vlgmr.msra.gmra.mxu0 %vm2684_vm12, %v3915_v45  ;;  %v1664_v55 = vpop.permute.xlu0 %1663 }
 0x17f   : > { %1175 = vrot.lane.b32.xlu1 %v4338_v56, %s4025_s4  ;;  %1754 = vst.msk [vmem:[#allocation3 + $0x18] sm:$0xf] %vm1747_vm8, %v1664_v55  ;;  %v211_v56 = vld [vmem:[%s4163_s28 + $0xf0] sm:$0xff]  ;;  %s3791_s28 = sshll.u32 %s4075_s16, 12 }
 0x180   : > { %1430 = vrot.lane.b32.xlu0 %v3649_v8, %s4026_s5  ;;  %300 = vst.msk [vmem:[#allocation2 + $0x181] sm:$0xff] %vm213_vm0, %v211_v56 }
 0x181   : > { %v1662_v53 = vpop.permute.xlu1 %1661 }
 0x182   : > { %1753 = vst.msk [vmem:[#allocation3 + $0x14] sm:$0xf] %vm1747_vm8, %v1662_v53  ;;  %v1918_v10 = vpop.permute.xlu0 %1917 }
 0x183   : > { %1428 = vrot.lane.b32.xlu1 %v3742_v2, %s4026_s5  ;;  %2010 = vst.msk [vmem:[#allocation3 + $0x10] sm:$0xf] %vm2005_vm9, %v1918_v10 }
 0x184   : > { %1683 = vrot.lane.b32.xlu0 %v3773_v50, %s4027_s6  ;;  %v1288_v50 = vld [vmem:[#allocation2 + $0x121] sm:$0xff] }
 0x185   : > { %v1666_v39 = vpop.permute.xlu1 %1665 }
 0x186   : > { %1755 = vst.msk [vmem:[#allocation3 + $0x1c] sm:$0xf] %vm1747_vm8, %v1666_v39  ;;  %v1922_v18 = vpop.permute.xlu0 %1921  ;;  %v3717_v39 = vpack.c.bf16 %v1803_v37, %v1803_v37 }
 0x187   : > { %1432 = vrot.lane.b32.xlu1 %v3650_v41, %s4026_s5  ;;  %2012 = vst.msk [vmem:[#allocation3 + $0x18] sm:$0xf] %vm2005_vm9, %v1922_v18  ;;  %v2060_v18 = vld [vmem:[#allocation2 + $0x139] sm:$0xff] }
 0x188   : > { %1687 = vrot.lane.b32.xlu0 %v3681_v33, %s4027_s6  ;;  %v3749_v20 = vpack.c.bf16 %v2060_v18, %v2060_v18 }
 0x189   : > { %v1920_v49 = vpop.permute.xlu1 %1919 }
 0x18a   : > { %2011 = vst.msk [vmem:[#allocation3 + $0x14] sm:$0xf] %vm2005_vm9, %v1920_v49  ;;  %v2175_v6 = vpop.permute.xlu0 %2174 }
 0x18b   : > { %1685 = vrot.lane.b32.xlu1 %v3774_v16, %s4027_s6  ;;  %2267 = vst.msk [vmem:[#allocation3 + $0x10] sm:$0xf] %vm2262_vm10, %v2175_v6  ;;  %v3653_v16 = vpack.c.bf16 %v1288_v50, %v1288_v50  ;;  %v2061_v6 = vld [vmem:[#allocation2 + $0x141] sm:$0xff] }
 0x18c   : > { %1941 = vrot.lane.b32.xlu0 %v3711_v42, %s4028_s7  ;;  %v1550_v50 = vld [vmem:[#allocation2 + $0x15a] sm:$0xff] }
 0x18d   : > { %v1924_v34 = vpop.permute.xlu1 %1923 }
 0x18e   : > { %2013 = vst.msk [vmem:[#allocation3 + $0x1c] sm:$0xf] %vm2005_vm9, %v1924_v34  ;;  %v2179_v44 = vpop.permute.xlu0 %2178 }
 0x18f   : > { %1689 = vrot.lane.b32.xlu1 %v3682_v25, %s4027_s6  ;;  %2269 = vst.msk [vmem:[#allocation3 + $0x18] sm:$0xf] %vm2262_vm10, %v2179_v44 }
 0x190   : > { %1945 = vrot.lane.b32.xlu0 %v3713_v38, %s4028_s7 }
 0x191   : > { %v2177_v51 = vpop.permute.xlu1 %2176 }
 0x192   : > { %2268 = vst.msk [vmem:[#allocation3 + $0x14] sm:$0xf] %vm2262_vm10, %v2177_v51  ;;  %v2432_v15 = vpop.permute.xlu0 %2431 }
 0x193   : > { %1943 = vrot.lane.b32.xlu1 %v3712_v19, %s4028_s7  ;;  %2524 = vst.msk [vmem:[#allocation3 + $0x10] sm:$0xf] %vm2519_vm11, %v2432_v15  ;;  %v3750_v19 = vpack.c.bf16 %v2061_v6, %v2061_v6  ;;  %v2318_v15 = vld [vmem:[#allocation2 + $0x142] sm:$0xff] }
 0x194   : > { %2198 = vrot.lane.b32.xlu0 %v3649_v8, %s4029_s8  ;;  %v3685_v8 = vpack.c.bf16 %v1545_v28, %v1545_v28  ;;  %v1808_v28 = vld [vmem:[#allocation2 + $0x170] sm:$0xff] }
 0x195   : > { %v2181_v57 = vpop.permute.xlu1 %2180 }
 0x196   : > { %2270 = vst.msk [vmem:[#allocation3 + $0x1c] sm:$0xf] %vm2262_vm10, %v2181_v57  ;;  %v2436_v26 = vpop.permute.xlu0 %2435 }
 0x197   : > { %1947 = vrot.lane.b32.xlu1 %v3714_v54, %s4028_s7  ;;  %2526 = vst.msk [vmem:[#allocation3 + $0x18] sm:$0xf] %vm2519_vm11, %v2436_v26  ;;  %v3782_v26 = vpack.c.bf16 %v2318_v15, %v2318_v15 }
 0x198   : > { %2202 = vrot.lane.b32.xlu0 %v3745_v58, %s4029_s8 }
 0x199   : > { %v2434_v22 = vpop.permute.xlu1 %2433 }
 0x19a   : > { %2525 = vst.msk [vmem:[#allocation3 + $0x14] sm:$0xf] %vm2519_vm11, %v2434_v22  ;;  %v1411_v24 = vpop.permute.xlu0 %1410 }
 0x19b   : > { %2200 = vrot.lane.b32.xlu1 %v3650_v41, %s4029_s8  ;;  %1499 = vst.msk [vmem:[#allocation3 + $0x20] sm:$0xf] %vm1490_vm7, %v1411_v24  ;;  %v3686_v41 = vpack.c.bf16 %v1546_v32, %v1546_v32  ;;  %v1036_v24 = vld [vmem:[#allocation2 + $0x158] sm:$0xff] }
 0x19c   : > { %2455 = vrot.lane.b32.xlu0 %v3681_v33, %s4030_s19 }
 0x19d   : > { %v2438_v62 = vpop.permute.xlu1 %2437 }
 0x19e   : > { %2527 = vst.msk [vmem:[#allocation3 + $0x1c] sm:$0xf] %vm2519_vm11, %v2438_v62  ;;  %v1415_v30 = vpop.permute.xlu0 %1414 }
 0x19f   : > { %2204 = vrot.lane.b32.xlu1 %v3746_v61, %s4029_s8  ;;  %1501 = vst.msk [vmem:[#allocation3 + $0x28] sm:$0xf] %vm1490_vm7, %v1415_v30  ;;  %v3626_v30 = vpack.c.bf16 %v1036_v24, %v1036_v24 }
 0x1a0   : > { %2459 = vrot.lane.b32.xlu0 %v3777_v23, %s4030_s19 }
 0x1a1   : > { %v1413_v29 = vpop.permute.xlu1 %1412  ;;  %v3916_v1 = vld [vmem:[#allocation3 + $0x10] sm:$0xff]  }
 0x1a2   : > { %1500 = vst.msk [vmem:[#allocation3 + $0x24] sm:$0xf] %vm1490_vm7, %v1413_v29  ;;  %3821 = vmatprep.mubr.msk.bf16.mxu0 %vm2684_vm12, %v3916_v1  ;;  %v1668_v48 = vpop.permute.xlu0 %1667 }
 0x1a3   : > { %2457 = vrot.lane.b32.xlu1 %v3682_v25, %s4030_s19  ;;  %1756 = vst.msk [vmem:[#allocation3 + $0x20] sm:$0xf] %vm1747_vm8, %v1668_v48 }
 0x1a4   : > { %1177 = vrot.lane.b32.xlu0 %v3713_v38, %s4025_s4  ;;  %v2317_v38 = vld [vmem:[#allocation2 + $0x13a] sm:$0xff] }
 0x1a5   : > { %v1417_v4 = vpop.permute.xlu1 %1416  ;;  %v3917_v21 = vld [vmem:[#allocation3 + $0x18] sm:$0xff]   ;;  %v3781_v52 = vpack.c.bf16 %v2317_v38, %v2317_v38 }
 0x1a6   : > { %1502 = vst.msk [vmem:[#allocation3 + $0x2c] sm:$0xf] %vm1490_vm7, %v1417_v4  ;;  %3822 = vmatmul.mubr.msk.bf16.gmra.mxu0 %vm2684_vm12, %v3917_v21  ;;  %v1672_v2 = vpop.permute.xlu0 %1671  ;;  %v1549_v4 = vld [vmem:[#allocation2 + $0x152] sm:$0xff] }
 0x1a7   : > { %2461 = vrot.lane.b32.xlu1 %v3778_v35, %s4030_s19  ;;  %1758 = vst.msk [vmem:[#allocation3 + $0x28] sm:$0xf] %vm1747_vm8, %v1672_v2  ;;  %v3689_v3 = vpack.c.bf16 %v1549_v4, %v1549_v4 }
 0x1a8   : > { %1181 = vrot.lane.b32.xlu0 %v3621_v47, %s4025_s4 }
 0x1a9   : > { %v1670_v13 = vpop.permute.xlu1 %1669 }
 0x1aa   : > { %1757 = vst.msk [vmem:[#allocation3 + $0x24] sm:$0xf] %vm1747_vm8, %v1670_v13  ;;  %v1926_v36 = vpop.permute.xlu0 %1925 }
 0x1ab   : > { %1179 = vrot.lane.b32.xlu1 %v3714_v54, %s4025_s4  ;;  %2014 = vst.msk [vmem:[#allocation3 + $0x20] sm:$0xf] %vm2005_vm9, %v1926_v36  ;;  %v1807_v36 = vld [vmem:[#allocation2 + $0x168] sm:$0xff] }
 0x1ac   : > { %1434 = vrot.lane.b32.xlu0 %v3745_v58, %s4026_s5  ;;  %v1035_v58 = vld [vmem:[#allocation2 + $0x150] sm:$0xff]  ;;  %v3721_v7 = vpack.c.bf16 %v1807_v36, %v1807_v36 }
 0x1ad   : > { %v1674_v5 = vpop.permute.xlu1 %1673  ;;  %v3625_v60 = vpack.c.bf16 %v1035_v58, %v1035_v58  ;;  %v1297_v58 = vld [vmem:[#allocation2 + $0x189] sm:$0xff] }
 0x1ae   : > { %1759 = vst.msk [vmem:[#allocation3 + $0x2c] sm:$0xf] %vm1747_vm8, %v1674_v5  ;;  %v1930_v12 = vpop.permute.xlu0 %1929  ;;  %v3690_v5 = vpack.c.bf16 %v1550_v50, %v1550_v50 }
 0x1af   : > { %1183 = vrot.lane.b32.xlu1 %v3622_v11, %s4025_s4  ;;  %2016 = vst.msk [vmem:[#allocation3 + $0x28] sm:$0xf] %vm2005_vm9, %v1930_v12 }
 0x1b0   : > { %1438 = vrot.lane.b32.xlu0 %v3653_v16, %s4026_s5 }
 0x1b1   : > { %v1928_v31 = vpop.permute.xlu1 %1927 }
 0x1b2   : > { %2015 = vst.msk [vmem:[#allocation3 + $0x24] sm:$0xf] %vm2005_vm9, %v1928_v31  ;;  %v2183_v40 = vpop.permute.xlu0 %2182 }
 0x1b3   : > { %1436 = vrot.lane.b32.xlu1 %v3746_v61, %s4026_s5  ;;  %2271 = vst.msk [vmem:[#allocation3 + $0x20] sm:$0xf] %vm2262_vm10, %v2183_v40 }
 0x1b4   : > { %1691 = vrot.lane.b32.xlu0 %v3777_v23, %s4027_s6  ;;  %v1292_v23 = vld [vmem:[#allocation2 + $0x151] sm:$0xff] }
 0x1b5   : > { %v1932_v45 = vpop.permute.xlu1 %1931  ;;  %v3657_v1 = vpack.c.bf16 %v1292_v23, %v1292_v23  ;;  %v1554_v23 = vld [vmem:[#allocation2 + $0x18a] sm:$0xff] }
 0x1b6   : > { %2017 = vst.msk [vmem:[#allocation3 + $0x2c] sm:$0xf] %vm2005_vm9, %v1932_v45  ;;  %v2187_v55 = vpop.permute.xlu0 %2186  ;;  %v2064_v45 = vld [vmem:[#allocation2 + $0x169] sm:$0xff] }
 0x1b7   : > { %1440 = vrot.lane.b32.xlu1 %v3654_v17, %s4026_s5  ;;  %2273 = vst.msk [vmem:[#allocation3 + $0x28] sm:$0xf] %vm2262_vm10, %v2187_v55  ;;  %v3753_v37 = vpack.c.bf16 %v2064_v45, %v2064_v45 }
 0x1b8   : > { %1695 = vrot.lane.b32.xlu0 %v3685_v8, %s4027_s6 }
 0x1b9   : > { %v2185_v53 = vpop.permute.xlu1 %2184 }
 0x1ba   : > { %2272 = vst.msk [vmem:[#allocation3 + $0x24] sm:$0xf] %vm2262_vm10, %v2185_v53  ;;  %v2440_v10 = vpop.permute.xlu0 %2439 }
 0x1bb   : > { %1693 = vrot.lane.b32.xlu1 %v3778_v35, %s4027_s6  ;;  %2528 = vst.msk [vmem:[#allocation3 + $0x20] sm:$0xf] %vm2519_vm11, %v2440_v10  ;;  %v1293_v35 = vld [vmem:[#allocation2 + $0x159] sm:$0xff]  ;;  %v2065_v10 = vld [vmem:[#allocation2 + $0x171] sm:$0xff] }
 0x1bc   : > { %1949 = vrot.lane.b32.xlu0 %v3621_v47, %s4028_s7  ;;  %v3658_v21 = vpack.c.bf16 %v1293_v35, %v1293_v35 }
 0x1bd   : > { %v2189_v56 = vpop.permute.xlu1 %2188 }
 0x1be   : > { %2274 = vst.msk [vmem:[#allocation3 + $0x2c] sm:$0xf] %vm2262_vm10, %v2189_v56  ;;  %v2444_v33 = vpop.permute.xlu0 %2443 }
 0x1bf   : > { %1697 = vrot.lane.b32.xlu1 %v3686_v41, %s4027_s6  ;;  %2530 = vst.msk [vmem:[#allocation3 + $0x28] sm:$0xf] %vm2519_vm11, %v2444_v33  ;;  %v3754_v33 = vpack.c.bf16 %v2065_v10, %v2065_v10 }
 0x1c0   : > { %1953 = vrot.lane.b32.xlu0 %v3717_v39, %s4028_s7 }
 0x1c1   : > { %v2442_v9 = vpop.permute.xlu1 %2441 }
 0x1c2   : > { %2529 = vst.msk [vmem:[#allocation3 + $0x24] sm:$0xf] %vm2519_vm11, %v2442_v9  ;;  %v1419_v49 = vpop.permute.xlu0 %1418 }
 0x1c3   : > { %1951 = vrot.lane.b32.xlu1 %v3622_v11, %s4028_s7  ;;  %1503 = vst.msk [vmem:[#allocation3 + $0x30] sm:$0xf] %vm1490_vm7, %v1419_v49  ;;  %v2322_v49 = vld [vmem:[#allocation2 + $0x172] sm:$0xff] }
 0x1c4   : > { %2206 = vrot.lane.b32.xlu0 %v3653_v16, %s4029_s8 }
 0x1c5   : > { %v2446_v42 = vpop.permute.xlu1 %2445 }
 0x1c6   : > { %2531 = vst.msk [vmem:[#allocation3 + $0x2c] sm:$0xf] %vm2519_vm11, %v2446_v42  ;;  %v1423_v25 = vpop.permute.xlu0 %1422 }
 0x1c7   : > { %1955 = vrot.lane.b32.xlu1 %v3718_v0, %s4028_s7  ;;  %1505 = vst.msk [vmem:[#allocation3 + $0x38] sm:$0xf] %vm1490_vm7, %v1423_v25  ;;  %v3786_v25 = vpack.c.bf16 %v2322_v49, %v2322_v49 }
 0x1c8   : > { %2210 = vrot.lane.b32.xlu0 %v3749_v20, %s4029_s8 }
 0x1c9   : > { %v1421_v27 = vpop.permute.xlu1 %1420  ;;  %v3918_v34 = vld [vmem:[#allocation3 + $0x20] sm:$0xff]  }
 0x1ca   : > { %1504 = vst.msk [vmem:[#allocation3 + $0x34] sm:$0xf] %vm1490_vm7, %v1421_v27  ;;  %3825 = vmatprep.mubr.msk.bf16.mxu0 %vm2684_vm12, %v3918_v34  ;;  %v1676_v44 = vpop.permute.xlu0 %1675 }
 0x1cb   : > { %2208 = vrot.lane.b32.xlu1 %v3654_v17, %s4029_s8  ;;  %1760 = vst.msk [vmem:[#allocation3 + $0x30] sm:$0xf] %vm1747_vm8, %v1676_v44 }
 0x1cc   : > { %2463 = vrot.lane.b32.xlu0 %v3685_v8, %s4030_s19  ;;  %v3722_v8 = vpack.c.bf16 %v1808_v28, %v1808_v28 }
 0x1cd   : > { %v1425_v46 = vpop.permute.xlu1 %1424  ;;  %v3919_v51 = vld [vmem:[#allocation3 + $0x28] sm:$0xff]  }
 0x1ce   : > { %1506 = vst.msk [vmem:[#allocation3 + $0x3c] sm:$0xf] %vm1490_vm7, %v1425_v46  ;;  %3826 = vmatmul.mubr.msk.bf16.gmra.mxu0 %vm2684_vm12, %v3919_v51  ;;  %v1680_v54 = vpop.permute.xlu0 %1679  ;;  %v1296_v46 = vld [vmem:[#allocation2 + $0x181] sm:$0xff] }
 0x1cf   : > { %2212 = vrot.lane.b32.xlu1 %v3750_v19, %s4029_s8  ;;  %1762 = vst.msk [vmem:[#allocation3 + $0x38] sm:$0xf] %vm1747_vm8, %v1680_v54  ;;  %v3661_v15 = vpack.c.bf16 %v1296_v46, %v1296_v46 }
 0x1d0   : > { %2467 = vrot.lane.b32.xlu0 %v3781_v52, %s4030_s19 }
 0x1d1   : > { %v1678_v57 = vpop.permute.xlu1 %1677 }
 0x1d2   : > { %1761 = vst.msk [vmem:[#allocation3 + $0x34] sm:$0xf] %vm1747_vm8, %v1678_v57  ;;  %v1934_v59 = vpop.permute.xlu0 %1933 }
 0x1d3   : > { %2465 = vrot.lane.b32.xlu1 %v3686_v41, %s4030_s19  ;;  %2018 = vst.msk [vmem:[#allocation3 + $0x30] sm:$0xf] %vm2005_vm9, %v1934_v59  ;;  %v1553_v59 = vld [vmem:[#allocation2 + $0x182] sm:$0xff] }
 0x1d4   : > { %1185 = vrot.lane.b32.xlu0 %v3717_v39, %s4025_s4  ;;  %v2321_v39 = vld [vmem:[#allocation2 + $0x16a] sm:$0xff]  ;;  %v3693_v24 = vpack.c.bf16 %v1553_v59, %v1553_v59 }
 0x1d5   : > { %v1682_v22 = vpop.permute.xlu1 %1681  ;;  %v3785_v18 = vpack.c.bf16 %v2321_v39, %v2321_v39 }
 0x1d6   : > { %1763 = vst.msk [vmem:[#allocation3 + $0x3c] sm:$0xf] %vm1747_vm8, %v1682_v22  ;;  %v1938_v61 = vpop.permute.xlu0 %1937  ;;  %v3662_v22 = vpack.c.bf16 %v1297_v58, %v1297_v58 }
 0x1d7   : > { %2469 = vrot.lane.b32.xlu1 %v3782_v26, %s4030_s19  ;;  %2020 = vst.msk [vmem:[#allocation3 + $0x38] sm:$0xf] %vm2005_vm9, %v1938_v61 }
 0x1d8   : > { %1189 = vrot.lane.b32.xlu0 %v3625_v60, %s4025_s4 }
 0x1d9   : > { %v1936_v62 = vpop.permute.xlu1 %1935 }
 0x1da   : > { %2019 = vst.msk [vmem:[#allocation3 + $0x34] sm:$0xf] %vm2005_vm9, %v1936_v62  ;;  %v2191_v63 = vpop.permute.xlu0 %2190 }
 0x1db   : > { %1187 = vrot.lane.b32.xlu1 %v3718_v0, %s4025_s4  ;;  %2275 = vst.msk [vmem:[#allocation3 + $0x30] sm:$0xf] %vm2262_vm10, %v2191_v63  ;;  %v1811_v63 = vld [vmem:[#allocation2 + $0x198] sm:$0xff] }
 0x1dc   : > { %1442 = vrot.lane.b32.xlu0 %v3749_v20, %s4026_s5  ;;  %v1039_v20 = vld [vmem:[#allocation2 + $0x180] sm:$0xff] }
 0x1dd   : > { %v1940_v29 = vpop.permute.xlu1 %1939  ;;  %v3629_v34 = vpack.c.bf16 %v1039_v20, %v1039_v20 }
 0x1de   : > { %2021 = vst.msk [vmem:[#allocation3 + $0x3c] sm:$0xf] %vm2005_vm9, %v1940_v29  ;;  %v2195_v43 = vpop.permute.xlu0 %2194  ;;  %v3694_v29 = vpack.c.bf16 %v1554_v23, %v1554_v23 }
 0x1df   : > { %1191 = vrot.lane.b32.xlu1 %v3626_v30, %s4025_s4  ;;  %2277 = vst.msk [vmem:[#allocation3 + $0x38] sm:$0xf] %vm2262_vm10, %v2195_v43 }
 0x1e0   : > { %1446 = vrot.lane.b32.xlu0 %v3657_v1, %s4026_s5 }
 0x1e1   : > { %v2193_v48 = vpop.permute.xlu1 %2192 }
 0x1e2   : > { %2276 = vst.msk [vmem:[#allocation3 + $0x34] sm:$0xf] %vm2262_vm10, %v2193_v48  ;;  %v2448_v47 = vpop.permute.xlu0 %2447  ;;  %v3725_v48 = vpack.c.bf16 %v1811_v63, %v1811_v63 }
 0x1e3   : > { %1444 = vrot.lane.b32.xlu1 %v3750_v19, %s4026_s5  ;;  %2532 = vst.msk [vmem:[#allocation3 + $0x30] sm:$0xf] %vm2519_vm11, %v2448_v47  ;;  %v1040_v19 = vld [vmem:[#allocation2 + $0x188] sm:$0xff] }
 0x1e4   : > { %1699 = vrot.lane.b32.xlu0 %v3781_v52, %s4027_s6  ;;  %v3630_v51 = vpack.c.bf16 %v1040_v19, %v1040_v19 }
 0x1e5   : > { %v2197_v2 = vpop.permute.xlu1 %2196 }
 0x1e6   : > { %2278 = vst.msk [vmem:[#allocation3 + $0x3c] sm:$0xf] %vm2262_vm10, %v2197_v2  ;;  %v2452_v13 = vpop.permute.xlu0 %2451 }
 0x1e7   : > { %1448 = vrot.lane.b32.xlu1 %v3658_v21, %s4026_s5  ;;  %2534 = vst.msk [vmem:[#allocation3 + $0x38] sm:$0xf] %vm2519_vm11, %v2452_v13 }
 0x1e8   : > { %1703 = vrot.lane.b32.xlu0 %v3689_v3, %s4027_s6 }
 0x1e9   : > { %v2450_v11 = vpop.permute.xlu1 %2449 }
 0x1ea   : > { %2533 = vst.msk [vmem:[#allocation3 + $0x34] sm:$0xf] %vm2519_vm11, %v2450_v11  ;;  %v1174_v16 = vpop.permute.xlu0 %1173 }
 0x1eb   : > { %1701 = vrot.lane.b32.xlu1 %v3782_v26, %s4027_s6  ;;  %1252 = vst.msk [vmem:[#allocation3 + $0x48] sm:$0xf] %vm1233_vm6, %v1174_v16  ;;  %v2069_v16 = vld [vmem:[#allocation2 + $0x1a1] sm:$0xff] }
 0x1ec   : > { %1957 = vrot.lane.b32.xlu0 %v3625_v60, %s4028_s7 }
 0x1ed   : > { %v2454_v12 = vpop.permute.xlu1 %2453 }
 0x1ee   : > { %2535 = vst.msk [vmem:[#allocation3 + $0x3c] sm:$0xf] %vm2519_vm11, %v2454_v12  ;;  %v1427_v31 = vpop.permute.xlu0 %1426 }
 0x1ef   : > { %1705 = vrot.lane.b32.xlu1 %v3690_v5, %s4027_s6  ;;  %1507 = vst.msk [vmem:[#allocation3 + $0x40] sm:$0xf] %vm1490_vm7, %v1427_v31  ;;  %v3758_v31 = vpack.c.bf16 %v2069_v16, %v2069_v16 }
 0x1f0   : > { %1961 = vrot.lane.b32.xlu0 %v3721_v7, %s4028_s7 }
 0x1f1   : > { %v1176_v17 = vpop.permute.xlu1 %1175  ;;  %v3920_v40 = vld [vmem:[#allocation3 + $0x30] sm:$0xff]  }
 0x1f2   : > { %1253 = vst.msk [vmem:[#allocation3 + $0x4c] sm:$0xf] %vm1233_vm6, %v1176_v17  ;;  %3829 = vmatprep.mubr.msk.bf16.mxu0 %vm2684_vm12, %v3920_v40  ;;  %v1431_v55 = vpop.permute.xlu0 %1430 }
 0x1f3   : > { %1959 = vrot.lane.b32.xlu1 %v3626_v30, %s4028_s7  ;;  %1509 = vst.msk [vmem:[#allocation3 + $0x48] sm:$0xf] %vm1490_vm7, %v1431_v55 }
 0x1f4   : > { %2214 = vrot.lane.b32.xlu0 %v3657_v1, %s4029_s8 }
 0x1f5   : > { %v1429_v32 = vpop.permute.xlu1 %1428  ;;  %v3921_v53 = vld [vmem:[#allocation3 + $0x38] sm:$0xff]  }
 0x1f6   : > { %1508 = vst.msk [vmem:[#allocation3 + $0x44] sm:$0xf] %vm1490_vm7, %v1429_v32  ;;  %3830 = vmatmul.mubr.msk.bf16.gmra.mxu0 %vm2684_vm12, %v3921_v53  ;;  %v1684_v41 = vpop.permute.xlu0 %1683 }
 0x1f7   : > { %1963 = vrot.lane.b32.xlu1 %v3722_v8, %s4028_s7  ;;  %1764 = vst.msk [vmem:[#allocation3 + $0x40] sm:$0xf] %vm1747_vm8, %v1684_v41 }
 0x1f8   : > { %2218 = vrot.lane.b32.xlu0 %v3753_v37, %s4029_s8 }
 0x1f9   : > { %v1433_v56 = vpop.permute.xlu1 %1432 }
 0x1fa   : > { %1510 = vst.msk [vmem:[#allocation3 + $0x4c] sm:$0xf] %vm1490_vm7, %v1433_v56  ;;  %v1688_v14 = vpop.permute.xlu0 %1687 }
 0x1fb   : > { %2216 = vrot.lane.b32.xlu1 %v3658_v21, %s4029_s8  ;;  %1766 = vst.msk [vmem:[#allocation3 + $0x48] sm:$0xf] %vm1747_vm8, %v1688_v14  ;;  %v1812_v21 = vld [vmem:[#allocation2 + $0x1a0] sm:$0xff] }
 0x1fc   : > { %2471 = vrot.lane.b32.xlu0 %v3689_v3, %s4030_s19  ;;  %v2068_v3 = vld [vmem:[#allocation2 + $0x199] sm:$0xff]  ;;  %v3726_v13 = vpack.c.bf16 %v1812_v21, %v1812_v21 }
 0x1fd   : > { %v1686_v9 = vpop.permute.xlu1 %1685  ;;  %v3757_v36 = vpack.c.bf16 %v2068_v3, %v2068_v3 }
 0x1fe   : > { %1765 = vst.msk [vmem:[#allocation3 + $0x44] sm:$0xf] %vm1747_vm8, %v1686_v9  ;;  %v1942_v0 = vpop.permute.xlu0 %1941 }
 0x1ff   : > { %2220 = vrot.lane.b32.xlu1 %v3754_v33, %s4029_s8  ;;  %2022 = vst.msk [vmem:[#allocation3 + $0x40] sm:$0xf] %vm2005_vm9, %v1942_v0 }
 0x200   : > { %2475 = vrot.lane.b32.xlu0 %v3785_v18, %s4030_s19 }
 0x201   : > { %v1690_v42 = vpop.permute.xlu1 %1689 }
 0x202   : > { %1767 = vst.msk [vmem:[#allocation3 + $0x4c] sm:$0xf] %vm1747_vm8, %v1690_v42  ;;  %v1946_v6 = vpop.permute.xlu0 %1945 }
 0x203   : > { %2473 = vrot.lane.b32.xlu1 %v3690_v5, %s4030_s19  ;;  %2024 = vst.msk [vmem:[#allocation3 + $0x48] sm:$0xf] %vm2005_vm9, %v1946_v6 }
 0x204   : > { %1193 = vrot.lane.b32.xlu0 %v3721_v7, %s4025_s4  ;;  %v2325_v7 = vld [vmem:[#allocation2 + $0x19a] sm:$0xff] }
 0x205   : > { %v1944_v27 = vpop.permute.xlu1 %1943  ;;  %v3789_v40 = vpack.c.bf16 %v2325_v7, %v2325_v7 }
 0x206   : > { %2023 = vst.msk [vmem:[#allocation3 + $0x44] sm:$0xf] %vm2005_vm9, %v1944_v27  ;;  %v2199_v38 = vpop.permute.xlu0 %2198 }
 0x207   : > { %2477 = vrot.lane.b32.xlu1 %v3786_v25, %s4030_s19  ;;  %2279 = vst.msk [vmem:[#allocation3 + $0x40] sm:$0xf] %vm2262_vm10, %v2199_v38 }
 0x208   : > { %1197 = vrot.lane.b32.xlu0 %v3629_v34, %s4025_s4 }
 0x209   : > { %v1948_v44 = vpop.permute.xlu1 %1947 }
 0x20a   : > { %2025 = vst.msk [vmem:[#allocation3 + $0x4c] sm:$0xf] %vm2005_vm9, %v1948_v44  ;;  %v2203_v52 = vpop.permute.xlu0 %2202 }
 0x20b   : > { %1195 = vrot.lane.b32.xlu1 %v3722_v8, %s4025_s4  ;;  %2281 = vst.msk [vmem:[#allocation3 + $0x48] sm:$0xf] %vm2262_vm10, %v2203_v52  ;;  %v2326_v8 = vld [vmem:[#allocation2 + $0x1a2] sm:$0xff] }
 0x20c   : > { %1450 = vrot.lane.b32.xlu0 %v3753_v37, %s4026_s5  ;;  %v3790_v32 = vpack.c.bf16 %v2326_v8, %v2326_v8 }
 0x20d   : > { %v2201_v54 = vpop.permute.xlu1 %2200 }
 0x20e   : > { %2280 = vst.msk [vmem:[#allocation3 + $0x44] sm:$0xf] %vm2262_vm10, %v2201_v54  ;;  %v2456_v57 = vpop.permute.xlu0 %2455 }
 0x20f   : > { %1199 = vrot.lane.b32.xlu1 %v3630_v51, %s4025_s4  ;;  %2536 = vst.msk [vmem:[#allocation3 + $0x40] sm:$0xf] %vm2519_vm11, %v2456_v57 }
 0x210   : > { %1454 = vrot.lane.b32.xlu0 %v3661_v15, %s4026_s5 }
 0x211   : > { %v2205_v26 = vpop.permute.xlu1 %2204 }
 0x212   : > { %2282 = vst.msk [vmem:[#allocation3 + $0x4c] sm:$0xf] %vm2262_vm10, %v2205_v26  ;;  %v2460_v60 = vpop.permute.xlu0 %2459 }
 0x213   : > { %1452 = vrot.lane.b32.xlu1 %v3754_v33, %s4026_s5  ;;  %2538 = vst.msk [vmem:[#allocation3 + $0x48] sm:$0xf] %vm2519_vm11, %v2460_v60 }
 0x214   : > { %1707 = vrot.lane.b32.xlu0 %v3785_v18, %s4027_s6 }
 0x215   : > { %v2458_v61 = vpop.permute.xlu1 %2457 }
 0x216   : > { %2537 = vst.msk [vmem:[#allocation3 + $0x44] sm:$0xf] %vm2519_vm11, %v2458_v61  ;;  %v1178_v62 = vpop.permute.xlu0 %1177 }
 0x217   : > { %1456 = vrot.lane.b32.xlu1 %v3662_v22, %s4026_s5  ;;  %1254 = vst.msk [vmem:[#allocation3 + $0x50] sm:$0xf] %vm1233_vm6, %v1178_v62 }
 0x218   : > { %1711 = vrot.lane.b32.xlu0 %v3693_v24, %s4027_s6 }
 0x219   : > { %v2462_v30 = vpop.permute.xlu1 %2461 }
 0x21a   : > { %2539 = vst.msk [vmem:[#allocation3 + $0x4c] sm:$0xf] %vm2519_vm11, %v2462_v30  ;;  %v1182_v1 = vpop.permute.xlu0 %1181 }
 0x21b   : > { %1709 = vrot.lane.b32.xlu1 %v3786_v25, %s4027_s6  ;;  %1256 = vst.msk [vmem:[#allocation3 + $0x58] sm:$0xf] %vm1233_vm6, %v1182_v1 }
 0x21c   : > { %1965 = vrot.lane.b32.xlu0 %v3629_v34, %s4028_s7 }
 0x21d   : > { %v1180_v43 = vpop.permute.xlu1 %1179  ;;  %v3922_v35 = vld [vmem:[#allocation3 + $0x40] sm:$0xff]  }
 0x21e   : > { %1255 = vst.msk [vmem:[#allocation3 + $0x54] sm:$0xf] %vm1233_vm6, %v1180_v43  ;;  %3833 = vmatprep.mubr.msk.bf16.mxu1 %vm2684_vm12, %v3922_v35  ;;  %v1435_v4 = vpop.permute.xlu0 %1434 }
 0x21f   : > { %1713 = vrot.lane.b32.xlu1 %v3694_v29, %s4027_s6  ;;  %1511 = vst.msk [vmem:[#allocation3 + $0x50] sm:$0xf] %vm1490_vm7, %v1435_v4  ;;  %s5025_s6 = scalar_lea.hbm %s5092_s2, %s3791_s28 }
 0x220   : > { %1969 = vrot.lane.b32.xlu0 %v3725_v48, %s4028_s7 }
 0x221   : > { %v1184_v47 = vpop.permute.xlu1 %1183  ;;  %v3923_v2 = vld [vmem:[#allocation3 + $0x48] sm:$0xff]  }
 0x222   : > { %1257 = vst.msk [vmem:[#allocation3 + $0x5c] sm:$0xf] %vm1233_vm6, %v1184_v47  ;;  %3834 = vmatmul.mubr.msk.bf16.vlgmr.msra.gmra.mxu1 %vm2684_vm12, %v3923_v2  ;;  %v1439_v50 = vpop.permute.xlu0 %1438 }
 0x223   : > { %1967 = vrot.lane.b32.xlu1 %v3630_v51, %s4028_s7  ;;  %1513 = vst.msk [vmem:[#allocation3 + $0x58] sm:$0xf] %vm1490_vm7, %v1439_v50 }
 0x224   : > { %2222 = vrot.lane.b32.xlu0 %v3661_v15, %s4029_s8 }
 0x225   : > { %v1437_v11 = vpop.permute.xlu1 %1436 }
 0x226   : > { %1512 = vst.msk [vmem:[#allocation3 + $0x54] sm:$0xf] %vm1490_vm7, %v1437_v11  ;;  %v1692_v5 = vpop.permute.xlu0 %1691 }
 0x227   : > { %1971 = vrot.lane.b32.xlu1 %v3726_v13, %s4028_s7  ;;  %1768 = vst.msk [vmem:[#allocation3 + $0x50] sm:$0xf] %vm1747_vm8, %v1692_v5  ;;  %s3039_s7 = scalar_lea.sflag [#allocation5], %s4922_s25 }
 0x228   : > { %2226 = vrot.lane.b32.xlu0 %v3757_v36, %s4029_s8 }
 0x229   : > { %v1441_v12 = vpop.permute.xlu1 %1440 }
 0x22a   : > { %1514 = vst.msk [vmem:[#allocation3 + $0x5c] sm:$0xf] %vm1490_vm7, %v1441_v12  ;;  %v1696_v28 = vpop.permute.xlu0 %1695 }
 0x22b   : > { %2224 = vrot.lane.b32.xlu1 %v3662_v22, %s4029_s8  ;;  %1770 = vst.msk [vmem:[#allocation3 + $0x58] sm:$0xf] %vm1747_vm8, %v1696_v28 }
 0x22c   : > { %2479 = vrot.lane.b32.xlu0 %v3693_v24, %s4030_s19 }
 0x22d   : > { %v1694_v17 = vpop.permute.xlu1 %1693 }
 0x22e   : > { %1769 = vst.msk [vmem:[#allocation3 + $0x54] sm:$0xf] %vm1747_vm8, %v1694_v17  ;;  %v1950_v45 = vpop.permute.xlu0 %1949 }
 0x22f   : > { %2228 = vrot.lane.b32.xlu1 %v3758_v31, %s4029_s8  ;;  %2026 = vst.msk [vmem:[#allocation3 + $0x50] sm:$0xf] %vm2005_vm9, %v1950_v45  ;;  %s3930_s8 = scalar_lea.vmem %s5028_s29, 4096 }
 0x230   : > { %2483 = vrot.lane.b32.xlu0 %v3789_v40, %s4030_s19  ;;  %p3931_p11 = scmp.ne.s32.totalorder %s5028_s29, %s3930_s8  ;;  %p3938_p1 = scmp.lt.s32.totalorder %s3936_s11, %s3930_s8 }
 0x231   : > { %v1698_v55 = vpop.permute.xlu1 %1697 }
 0x232   : > { %1771 = vst.msk [vmem:[#allocation3 + $0x5c] sm:$0xf] %vm1747_vm8, %v1698_v55  ;;  %v1954_v53 = vpop.permute.xlu0 %1953  ;;  %p3932_p12 = pnand %p3931_p11, %p4092_p5  ;;  %p3939_p2 = por %p3938_p1, %p3937_p0 }
 0x233   : > { %2481 = vrot.lane.b32.xlu1 %v3694_v29, %s4030_s19  ;;  %2028 = vst.msk [vmem:[#allocation3 + $0x58] sm:$0xf] %vm2005_vm9, %v1954_v53 }
 0x234   : > { %p3933_p13 = pneg %p3932_p12 }
 0x235   : > { %v1952_v37 = vpop.permute.xlu1 %1951 }
 0x236   : > { %2027 = vst.msk [vmem:[#allocation3 + $0x54] sm:$0xf] %vm2005_vm9, %v1952_v37  ;;  %v2207_v41 = vpop.permute.xlu0 %2206  ;;  %p3940_p3 = pnand %p3939_p2, %p3933_p13 }
 0x237   : > { %2485 = vrot.lane.b32.xlu1 %v3790_v32, %s4030_s19  ;;  %2283 = vst.msk [vmem:[#allocation3 + $0x50] sm:$0xf] %vm2262_vm10, %v2207_v41 }
 0x239   : > { %v1956_v10 = vpop.permute.xlu1 %1955 }
 0x23a   : > { %2029 = vst.msk [vmem:[#allocation3 + $0x5c] sm:$0xf] %vm2005_vm9, %v1956_v10  ;;  %v2211_v56 = vpop.permute.xlu0 %2210 }
 0x23b   : > { %2285 = vst.msk [vmem:[#allocation3 + $0x58] sm:$0xf] %vm2262_vm10, %v2211_v56 }
 0x23d   : > { %v2209_v39 = vpop.permute.xlu1 %2208 }
 0x23e   : > { %2284 = vst.msk [vmem:[#allocation3 + $0x54] sm:$0xf] %vm2262_vm10, %v2209_v39  ;;  %v3819_v33 = vpop.f32.mrf.mxu0  ;;  %v2464_v14 = vpop.permute.xlu0 %2463 }
 0x23f   : > { %2900 = vst [vmem:[%s4929_s27 + $0x10] sm:$0xff] %v3819_v33  ;;  %2540 = vst.msk [vmem:[#allocation3 + $0x50] sm:$0xf] %vm2519_vm11, %v2464_v14  ;;  %v2970_v38 = vmul.f32 %v3819_v33, %v3819_v33 }
 0x240   : > { %v2771_v18 = vpop.f32.mrf.mxu0 }
 0x241   : > { %v2213_v9 = vpop.permute.xlu1 %2212  ;;  %2898 = vst [vmem:[%s4929_s27] sm:$0xff] %v2771_v18  ;;  %v2968_v25 = vmul.f32 %v2771_v18, %v2771_v18 }
 0x242   : > { %2286 = vst.msk [vmem:[#allocation3 + $0x5c] sm:$0xf] %vm2262_vm10, %v2213_v9  ;;  %v3820_v0 = vpop.f32.mrf.mxu0  ;;  %v2468_v49 = vpop.permute.xlu0 %2467 }
 0x243   : > { %2901 = vst [vmem:[%s4929_s27 + $0x18] sm:$0xff] %v3820_v0  ;;  %2542 = vst.msk [vmem:[#allocation3 + $0x58] sm:$0xf] %vm2519_vm11, %v2468_v49  ;;  %v2971_v51 = vmul.f32 %v3820_v0, %v3820_v0 }
 0x244   : > { %v2774_v20 = vpop.f32.mrf.mxu0 }
 0x245   : > { %v2466_v42 = vpop.permute.xlu1 %2465  ;;  %2899 = vst [vmem:[%s4929_s27 + $0x8] sm:$0xff] %v2774_v20  ;;  %v2930_v6 = vadd.f32 %v2774_v20, %v2771_v18  ;;  %v2969_v27 = vmul.f32 %v2774_v20, %v2774_v20 }
 0x246   : > { %2541 = vst.msk [vmem:[#allocation3 + $0x54] sm:$0xf] %vm2519_vm11, %v2466_v42  ;;  %v1186_v34 = vpop.permute.xlu0 %1185 }
 0x247   : > { %v2931_v19 = vadd.f32 %v3819_v33, %v2930_v6  ;;  %v3000_v44 = vadd.f32 %v2969_v27, %v2968_v25  ;;  %1258 = vst.msk [vmem:[#allocation3 + $0x60] sm:$0xf] %vm1233_vm6, %v1186_v34 }
 0x249   : > { %v2470_v46 = vpop.permute.xlu1 %2469  ;;  %v3001_v52 = vadd.f32 %v3000_v44, %v2970_v38  ;;  %v2932_v54 = vadd.f32 %v3820_v0, %v2931_v19 }
 0x24a   : > { %2543 = vst.msk [vmem:[#allocation3 + $0x5c] sm:$0xf] %vm2519_vm11, %v2470_v46  ;;  %v1190_v15 = vpop.permute.xlu0 %1189 }
 0x24b   : > { %1260 = vst.msk [vmem:[#allocation3 + $0x68] sm:$0xf] %vm1233_vm6, %v1190_v15  ;;  %v3002_v57 = vadd.f32 %v3001_v52, %v2971_v51 }
 0x24d   : > { %v1188_v58 = vpop.permute.xlu1 %1187  ;;  %v3924_v26 = vld [vmem:[#allocation3 + $0x50] sm:$0xff]  }
 0x24e   : > { %1259 = vst.msk [vmem:[#allocation3 + $0x64] sm:$0xf] %vm1233_vm6, %v1188_v58  ;;  %3837 = vmatprep.mubr.msk.bf16.mxu1 %vm2684_vm12, %v3924_v26  ;;  %v1443_v59 = vpop.permute.xlu0 %1442 }
 0x24f   : > { %1515 = vst.msk [vmem:[#allocation3 + $0x60] sm:$0xf] %vm1490_vm7, %v1443_v59 }
 0x251   : > { %v1192_v22 = vpop.permute.xlu1 %1191  ;;  %v3925_v60 = vld [vmem:[#allocation3 + $0x58] sm:$0xff]  }
 0x252   : > { %1261 = vst.msk [vmem:[#allocation3 + $0x6c] sm:$0xf] %vm1233_vm6, %v1192_v22  ;;  %3838 = vmatmul.mubr.msk.bf16.gmra.mxu1 %vm2684_vm12, %v3925_v60  ;;  %v1447_v61 = vpop.permute.xlu0 %1446 }
 0x253   : > { %1517 = vst.msk [vmem:[#allocation3 + $0x68] sm:$0xf] %vm1490_vm7, %v1447_v61 }
 0x255   : > { %v1445_v24 = vpop.permute.xlu1 %1444 }
 0x256   : > { %1516 = vst.msk [vmem:[#allocation3 + $0x64] sm:$0xf] %vm1490_vm7, %v1445_v24  ;;  %v1700_v62 = vpop.permute.xlu0 %1699 }
 0x257   : > { %1772 = vst.msk [vmem:[#allocation3 + $0x60] sm:$0xf] %vm1747_vm8, %v1700_v62 }
 0x259   : > { %v1449_v23 = vpop.permute.xlu1 %1448 }
 0x25a   : > { %1518 = vst.msk [vmem:[#allocation3 + $0x6c] sm:$0xf] %vm1490_vm7, %v1449_v23  ;;  %v1704_v30 = vpop.permute.xlu0 %1703 }
 0x25b   : > { %1774 = vst.msk [vmem:[#allocation3 + $0x68] sm:$0xf] %vm1747_vm8, %v1704_v30 }
 0x25d   : > { %v1702_v63 = vpop.permute.xlu1 %1701 }
 0x25e   : > { %1773 = vst.msk [vmem:[#allocation3 + $0x64] sm:$0xf] %vm1747_vm8, %v1702_v63  ;;  %v1958_v29 = vpop.permute.xlu0 %1957 }
 0x25f   : > { %2030 = vst.msk [vmem:[#allocation3 + $0x60] sm:$0xf] %vm2005_vm9, %v1958_v29 }
 0x261   : > { %v1706_v1 = vpop.permute.xlu1 %1705 }
 0x262   : > { %1775 = vst.msk [vmem:[#allocation3 + $0x6c] sm:$0xf] %vm1747_vm8, %v1706_v1  ;;  %v1962_v43 = vpop.permute.xlu0 %1961 }
 0x263   : > { %2032 = vst.msk [vmem:[#allocation3 + $0x68] sm:$0xf] %vm2005_vm9, %v1962_v43 }
 0x265   : > { %v1960_v35 = vpop.permute.xlu1 %1959 }
 0x266   : > { %2031 = vst.msk [vmem:[#allocation3 + $0x64] sm:$0xf] %vm2005_vm9, %v1960_v35  ;;  %v3823_v48 = vpop.f32.mrf.mxu0  ;;  %v2215_v4 = vpop.permute.xlu0 %2214 }
 0x267   : > { %2904 = vst [vmem:[%s4929_s27 + $0x30] sm:$0xff] %v3823_v48  ;;  %2287 = vst.msk [vmem:[#allocation3 + $0x60] sm:$0xf] %vm2262_vm10, %v2215_v4  ;;  %v2974_v31 = vmul.f32 %v3823_v48, %v3823_v48 }
 0x268   : > { %v2787_v47 = vpop.f32.mrf.mxu0 }
 0x269   : > { %v1964_v21 = vpop.permute.xlu1 %1963  ;;  %2902 = vst [vmem:[%s4929_s27 + $0x20] sm:$0xff] %v2787_v47  ;;  %v2933_v2 = vadd.f32 %v2932_v54, %v2787_v47  ;;  %v2972_v3 = vmul.f32 %v2787_v47, %v2787_v47 }
 0x26a   : > { %2033 = vst.msk [vmem:[#allocation3 + $0x6c] sm:$0xf] %vm2005_vm9, %v1964_v21  ;;  %v3824_v13 = vpop.f32.mrf.mxu0  ;;  %v2219_v50 = vpop.permute.xlu0 %2218 }
 0x26b   : > { %v3003_v11 = vadd.f32 %v3002_v57, %v2972_v3  ;;  %2905 = vst [vmem:[%s4929_s27 + $0x38] sm:$0xff] %v3824_v13  ;;  %2289 = vst.msk [vmem:[#allocation3 + $0x68] sm:$0xf] %vm2262_vm10, %v2219_v50  ;;  %v2975_v45 = vmul.f32 %v3824_v13, %v3824_v13 }
 0x26c   : > { %v2790_v5 = vpop.f32.mrf.mxu0 }
 0x26d   : > { %v2217_v36 = vpop.permute.xlu1 %2216  ;;  %2903 = vst [vmem:[%s4929_s27 + $0x28] sm:$0xff] %v2790_v5  ;;  %v2934_v16 = vadd.f32 %v2933_v2, %v2790_v5  ;;  %v2973_v12 = vmul.f32 %v2790_v5, %v2790_v5 }
 0x26e   : > { %2288 = vst.msk [vmem:[#allocation3 + $0x64] sm:$0xf] %vm2262_vm10, %v2217_v36  ;;  %v2472_v7 = vpop.permute.xlu0 %2471 }
 0x26f   : > { %v2935_v28 = vadd.f32 %v3823_v48, %v2934_v16  ;;  %v3004_v17 = vadd.f32 %v3003_v11, %v2973_v12  ;;  %2544 = vst.msk [vmem:[#allocation3 + $0x60] sm:$0xf] %vm2519_vm11, %v2472_v7 }
 0x271   : > { %v2221_v40 = vpop.permute.xlu1 %2220  ;;  %v3005_v8 = vadd.f32 %v3004_v17, %v2974_v31  ;;  %v2936_v55 = vadd.f32 %v3824_v13, %v2935_v28 }
 0x272   : > { %2290 = vst.msk [vmem:[#allocation3 + $0x6c] sm:$0xf] %vm2262_vm10, %v2221_v40  ;;  %v2476_v32 = vpop.permute.xlu0 %2475 }
 0x273   : > { %2546 = vst.msk [vmem:[#allocation3 + $0x68] sm:$0xf] %vm2519_vm11, %v2476_v32  ;;  %v3006_v53 = vadd.f32 %v3005_v8, %v2975_v45 }
 0x275   : > { %v2474_v37 = vpop.permute.xlu1 %2473 }
 0x276   : > { %2545 = vst.msk [vmem:[#allocation3 + $0x64] sm:$0xf] %vm2519_vm11, %v2474_v37  ;;  %v1194_v41 = vpop.permute.xlu0 %1193 }
 0x277   : > { %1262 = vst.msk [vmem:[#allocation3 + $0x70] sm:$0xf] %vm1233_vm6, %v1194_v41 }
 0x279   : > { %v2478_v10 = vpop.permute.xlu1 %2477 }
 0x27a   : > { %2547 = vst.msk [vmem:[#allocation3 + $0x6c] sm:$0xf] %vm2519_vm11, %v2478_v10  ;;  %v1198_v56 = vpop.permute.xlu0 %1197 }
 0x27b   : > { %1264 = vst.msk [vmem:[#allocation3 + $0x78] sm:$0xf] %vm1233_vm6, %v1198_v56 }
 0x27d   : > { %v1196_v39 = vpop.permute.xlu1 %1195  ;;  %v3926_v33 = vld [vmem:[#allocation3 + $0x60] sm:$0xff]  }
 0x27e   : > { %1263 = vst.msk [vmem:[#allocation3 + $0x74] sm:$0xf] %vm1233_vm6, %v1196_v39  ;;  %3841 = vmatprep.mubr.msk.bf16.mxu1 %vm2684_vm12, %v3926_v33  ;;  %v1451_v14 = vpop.permute.xlu0 %1450 }
 0x27f   : > { %1519 = vst.msk [vmem:[#allocation3 + $0x70] sm:$0xf] %vm1490_vm7, %v1451_v14 }
 0x281   : > { %v1200_v9 = vpop.permute.xlu1 %1199  ;;  %v3927_v18 = vld [vmem:[#allocation3 + $0x68] sm:$0xff]  }
 0x282   : > { %1265 = vst.msk [vmem:[#allocation3 + $0x7c] sm:$0xf] %vm1233_vm6, %v1200_v9  ;;  %3842 = vmatmul.mubr.msk.bf16.gmra.mxu1 %vm2684_vm12, %v3927_v18  ;;  %v1455_v0 = vpop.permute.xlu0 %1454 }
 0x283   : > { %1521 = vst.msk [vmem:[#allocation3 + $0x78] sm:$0xf] %vm1490_vm7, %v1455_v0 }
 0x285   : > { %v1453_v49 = vpop.permute.xlu1 %1452 }
 0x286   : > { %1520 = vst.msk [vmem:[#allocation3 + $0x74] sm:$0xf] %vm1490_vm7, %v1453_v49  ;;  %v1708_v42 = vpop.permute.xlu0 %1707 }
 0x287   : > { %1776 = vst.msk [vmem:[#allocation3 + $0x70] sm:$0xf] %vm1747_vm8, %v1708_v42 }
 0x289   : > { %v1457_v20 = vpop.permute.xlu1 %1456 }
 0x28a   : > { %1522 = vst.msk [vmem:[#allocation3 + $0x7c] sm:$0xf] %vm1490_vm7, %v1457_v20  ;;  %v1712_v25 = vpop.permute.xlu0 %1711 }
 0x28b   : > { %1778 = vst.msk [vmem:[#allocation3 + $0x78] sm:$0xf] %vm1747_vm8, %v1712_v25 }
 0x28d   : > { %v1710_v6 = vpop.permute.xlu1 %1709 }
 0x28e   : > { %1777 = vst.msk [vmem:[#allocation3 + $0x74] sm:$0xf] %vm1747_vm8, %v1710_v6  ;;  %v3827_v27 = vpop.f32.mrf.mxu0  ;;  %v1966_v34 = vpop.permute.xlu0 %1965 }
 0x28f   : > { %2908 = vst [vmem:[%s4929_s27 + $0x50] sm:$0xff] %v3827_v27  ;;  %2034 = vst.msk [vmem:[#allocation3 + $0x70] sm:$0xf] %vm2005_vm9, %v1966_v34  ;;  %v2978_v22 = vmul.f32 %v3827_v27, %v3827_v27 }
 0x290   : > { %v2803_v19 = vpop.f32.mrf.mxu0 }
 0x291   : > { %v1714_v38 = vpop.permute.xlu1 %1713  ;;  %2906 = vst [vmem:[%s4929_s27 + $0x40] sm:$0xff] %v2803_v19  ;;  %v2937_v44 = vadd.f32 %v2936_v55, %v2803_v19  ;;  %v2976_v46 = vmul.f32 %v2803_v19, %v2803_v19 }
 0x292   : > { %1779 = vst.msk [vmem:[#allocation3 + $0x7c] sm:$0xf] %vm1747_vm8, %v1714_v38  ;;  %v3828_v51 = vpop.f32.mrf.mxu0  ;;  %v1970_v52 = vpop.permute.xlu0 %1969 }
 0x293   : > { %v3007_v54 = vadd.f32 %v3006_v53, %v2976_v46  ;;  %2909 = vst [vmem:[%s4929_s27 + $0x58] sm:$0xff] %v3828_v51  ;;  %2036 = vst.msk [vmem:[#allocation3 + $0x78] sm:$0xf] %vm2005_vm9, %v1970_v52  ;;  %v2979_v62 = vmul.f32 %v3828_v51, %v3828_v51 }
 0x294   : > { %v2806_v57 = vpop.f32.mrf.mxu0 }
 0x295   : > { %v1968_v15 = vpop.permute.xlu1 %1967  ;;  %2907 = vst [vmem:[%s4929_s27 + $0x48] sm:$0xff] %v2806_v57  ;;  %v2938_v58 = vadd.f32 %v2937_v44, %v2806_v57  ;;  %v2977_v26 = vmul.f32 %v2806_v57, %v2806_v57 }
 0x296   : > { %2035 = vst.msk [vmem:[#allocation3 + $0x74] sm:$0xf] %vm2005_vm9, %v1968_v15  ;;  %v2223_v59 = vpop.permute.xlu0 %2222 }
 0x297   : > { %v2939_v60 = vadd.f32 %v3827_v27, %v2938_v58  ;;  %v3008_v61 = vadd.f32 %v3007_v54, %v2977_v26  ;;  %2291 = vst.msk [vmem:[#allocation3 + $0x70] sm:$0xf] %vm2262_vm10, %v2223_v59 }
 0x299   : > { %v1972_v24 = vpop.permute.xlu1 %1971  ;;  %v3009_v23 = vadd.f32 %v3008_v61, %v2978_v22  ;;  %v2940_v30 = vadd.f32 %v3828_v51, %v2939_v60 }
 0x29a   : > { %2037 = vst.msk [vmem:[#allocation3 + $0x7c] sm:$0xf] %vm2005_vm9, %v1972_v24  ;;  %v2227_v63 = vpop.permute.xlu0 %2226 }
 0x29b   : > { %2293 = vst.msk [vmem:[#allocation3 + $0x78] sm:$0xf] %vm2262_vm10, %v2227_v63  ;;  %v3010_v29 = vadd.f32 %v3009_v23, %v2979_v62 }
 0x29d   : > { %v2225_v1 = vpop.permute.xlu1 %2224 }
 0x29e   : > { %2292 = vst.msk [vmem:[#allocation3 + $0x74] sm:$0xf] %vm2262_vm10, %v2225_v1  ;;  %v2480_v43 = vpop.permute.xlu0 %2479 }
 0x29f   : > { %2548 = vst.msk [vmem:[#allocation3 + $0x70] sm:$0xf] %vm2519_vm11, %v2480_v43 }
 0x2a1   : > { %v2229_v35 = vpop.permute.xlu1 %2228 }
 0x2a2   : > { %2294 = vst.msk [vmem:[#allocation3 + $0x7c] sm:$0xf] %vm2262_vm10, %v2229_v35  ;;  %v2484_v48 = vpop.permute.xlu0 %2483 }
 0x2a3   : > { %2550 = vst.msk [vmem:[#allocation3 + $0x78] sm:$0xf] %vm2519_vm11, %v2484_v48 }
 0x2a5   : > { %v2482_v4 = vpop.permute.xlu1 %2481 }
 0x2a6   : > { %2549 = vst.msk [vmem:[#allocation3 + $0x74] sm:$0xf] %vm2519_vm11, %v2482_v4 }
 0x2a9   : > { %v2486_v21 = vpop.permute.xlu1 %2485 }
 0x2aa   : > { %2551 = vst.msk [vmem:[#allocation3 + $0x7c] sm:$0xf] %vm2519_vm11, %v2486_v21 }
 0x2ad   : > { %v3928_v47 = vld [vmem:[#allocation3 + $0x70] sm:$0xff]  }
 0x2ae   : > { %3845 = vmatprep.mubr.msk.bf16.mxu1 %vm2684_vm12, %v3928_v47 }
 0x2b1   : > { %v3929_v2 = vld [vmem:[#allocation3 + $0x78] sm:$0xff]  }
 0x2b2   : > { %3846 = vmatmul.mubr.msk.bf16.gmra.mxu1 %vm2684_vm12, %v3929_v2 }
 0x2b6   : > { %v3831_v3 = vpop.f32.mrf.mxu0 }
 0x2b7   : > { %2912 = vst [vmem:[%s4929_s27 + $0x70] sm:$0xff] %v3831_v3  ;;  %v2982_v31 = vmul.f32 %v3831_v3, %v3831_v3 }
 0x2b8   : > { %v2819_v13 = vpop.f32.mrf.mxu0 }
 0x2b9   : > { %2910 = vst [vmem:[%s4929_s27 + $0x60] sm:$0xff] %v2819_v13  ;;  %v2941_v50 = vadd.f32 %v2940_v30, %v2819_v13  ;;  %v2980_v11 = vmul.f32 %v2819_v13, %v2819_v13 }
 0x2ba   : > { %v3832_v36 = vpop.f32.mrf.mxu0 }
 0x2bb   : > { %v3011_v5 = vadd.f32 %v3010_v29, %v2980_v11  ;;  %2913 = vst [vmem:[%s4929_s27 + $0x78] sm:$0xff] %v3832_v36  ;;  %v2983_v40 = vmul.f32 %v3832_v36, %v3832_v36 }
 0x2bc   : > { %v2822_v16 = vpop.f32.mrf.mxu0 }
 0x2bd   : > { %2911 = vst [vmem:[%s4929_s27 + $0x68] sm:$0xff] %v2822_v16  ;;  %v2942_v12 = vadd.f32 %v2941_v50, %v2822_v16  ;;  %v2981_v7 = vmul.f32 %v2822_v16, %v2822_v16 }
 0x2bf   : > { %v2943_v28 = vadd.f32 %v3831_v3, %v2942_v12  ;;  %v3012_v17 = vadd.f32 %v3011_v5, %v2981_v7 }
 0x2c1   : > { %v3013_v45 = vadd.f32 %v3012_v17, %v2982_v31  ;;  %v2944_v8 = vadd.f32 %v3832_v36, %v2943_v28 }
 0x2c3   : > { %v3014_v55 = vadd.f32 %v3013_v45, %v2983_v40 }
 0x2e2   : > { %v3835_v32 = vpop.f32.mrf.mxu1 }
 0x2e3   : > { %2916 = vst [vmem:[%s4929_s27 + $0x90] sm:$0xff] %v3835_v32  ;;  %v2986_v9 = vmul.f32 %v3835_v32, %v3835_v32 }
 0x2e4   : > { %v2835_v53 = vpop.f32.mrf.mxu1 }
 0x2e5   : > { %2914 = vst [vmem:[%s4929_s27 + $0x80] sm:$0xff] %v2835_v53  ;;  %v2945_v37 = vadd.f32 %v2944_v8, %v2835_v53  ;;  %v2984_v41 = vmul.f32 %v2835_v53, %v2835_v53 }
 0x2e6   : > { %v3836_v10 = vpop.f32.mrf.mxu1 }
 0x2e7   : > { %v3015_v56 = vadd.f32 %v3014_v55, %v2984_v41  ;;  %2917 = vst [vmem:[%s4929_s27 + $0x98] sm:$0xff] %v3836_v10  ;;  %v2987_v49 = vmul.f32 %v3836_v10, %v3836_v10 }
 0x2e8   : > { %v2838_v39 = vpop.f32.mrf.mxu1 }
 0x2e9   : > { %2915 = vst [vmem:[%s4929_s27 + $0x88] sm:$0xff] %v2838_v39  ;;  %v2946_v33 = vadd.f32 %v2945_v37, %v2838_v39  ;;  %v2985_v14 = vmul.f32 %v2838_v39, %v2838_v39 }
 0x2eb   : > { %v2947_v18 = vadd.f32 %v3835_v32, %v2946_v33  ;;  %v3016_v0 = vadd.f32 %v3015_v56, %v2985_v14 }
 0x2ed   : > { %v3017_v42 = vadd.f32 %v3016_v0, %v2986_v9  ;;  %v2948_v20 = vadd.f32 %v3836_v10, %v2947_v18 }
 0x2ef   : > { %v3018_v25 = vadd.f32 %v3017_v42, %v2987_v49 }
 0x312   : > { %v3839_v6 = vpop.f32.mrf.mxu1 }
 0x313   : > { %2920 = vst [vmem:[%s4929_s27 + $0xb0] sm:$0xff] %v3839_v6  ;;  %v2990_v54 = vmul.f32 %v3839_v6, %v3839_v6 }
 0x314   : > { %v2851_v27 = vpop.f32.mrf.mxu1 }
 0x315   : > { %2918 = vst [vmem:[%s4929_s27 + $0xa0] sm:$0xff] %v2851_v27  ;;  %v2949_v34 = vadd.f32 %v2948_v20, %v2851_v27  ;;  %v2988_v38 = vmul.f32 %v2851_v27, %v2851_v27 }
 0x316   : > { %v3840_v19 = vpop.f32.mrf.mxu1 }
 0x317   : > { %v3019_v44 = vadd.f32 %v3018_v25, %v2988_v38  ;;  %2921 = vst [vmem:[%s4929_s27 + $0xb8] sm:$0xff] %v3840_v19  ;;  %v2991_v58 = vmul.f32 %v3840_v19, %v3840_v19 }
 0x318   : > { %v2854_v46 = vpop.f32.mrf.mxu1 }
 0x319   : > { %2919 = vst [vmem:[%s4929_s27 + $0xa8] sm:$0xff] %v2854_v46  ;;  %v2950_v51 = vadd.f32 %v2949_v34, %v2854_v46  ;;  %v2989_v52 = vmul.f32 %v2854_v46, %v2854_v46 }
 0x31b   : > { %v2951_v15 = vadd.f32 %v3839_v6, %v2950_v51  ;;  %v3020_v57 = vadd.f32 %v3019_v44, %v2989_v52 }
 0x31d   : > { %v3021_v26 = vadd.f32 %v3020_v57, %v2990_v54  ;;  %v2952_v59 = vadd.f32 %v3840_v19, %v2951_v15 }
 0x31f   : > { %v3022_v22 = vadd.f32 %v3021_v26, %v2991_v58 }
 0x342   : > { %v3843_v60 = vpop.f32.mrf.mxu1 }
 0x343   : > { %2924 = vst [vmem:[%s4929_s27 + $0xd0] sm:$0xff] %v3843_v60  ;;  %v2994_v35 = vmul.f32 %v3843_v60, %v3843_v60 }
 0x344   : > { %v2867_v61 = vpop.f32.mrf.mxu1 }
 0x345   : > { %2922 = vst [vmem:[%s4929_s27 + $0xc0] sm:$0xff] %v2867_v61  ;;  %v2992_v23 = vmul.f32 %v2867_v61, %v2867_v61  ;;  %v2953_v30 = vadd.f32 %v2952_v59, %v2867_v61 }
 0x346   : > { %v3844_v24 = vpop.f32.mrf.mxu1 }
 0x347   : > { %2925 = vst [vmem:[%s4929_s27 + $0xd8] sm:$0xff] %v3844_v24  ;;  %v3023_v29 = vadd.f32 %v3022_v22, %v2992_v23  ;;  %v2995_v2 = vmul.f32 %v3844_v24, %v3844_v24 }
 0x348   : > { %v2870_v62 = vpop.f32.mrf.mxu1 }
 0x349   : > { %2923 = vst [vmem:[%s4929_s27 + $0xc8] sm:$0xff] %v2870_v62  ;;  %v2993_v63 = vmul.f32 %v2870_v62, %v2870_v62  ;;  %v2954_v1 = vadd.f32 %v2953_v30, %v2870_v62 }
 0x34b   : > { %v3024_v43 = vadd.f32 %v3023_v29, %v2993_v63  ;;  %v2955_v48 = vadd.f32 %v3843_v60, %v2954_v1 }
 0x34d   : > { %v3025_v21 = vadd.f32 %v3024_v43, %v2994_v35  ;;  %v2956_v3 = vadd.f32 %v3844_v24, %v2955_v48 }
 0x34f   : > { %v3026_v36 = vadd.f32 %v3025_v21, %v2995_v2 }
 0x372   : > { %v3847_v4 = vpop.f32.mrf.mxu1 }
 0x373   : > { %2928 = vst [vmem:[%s4929_s27 + $0xf0] sm:$0xff] %v3847_v4 }
 0x374   : > { %v2883_v47 = vpop.f32.mrf.mxu1 }
 0x375   : > { %2926 = vst [vmem:[%s4929_s27 + $0xe0] sm:$0xff] %v2883_v47  ;;  %v2996_v13 = vmul.f32 %v2883_v47, %v2883_v47  ;;  %v2957_v11 = vadd.f32 %v2956_v3, %v2883_v47 }
 0x376   : > { %v3848_v50 = vpop.f32.mrf.mxu1 }
 0x377   : > { %2929 = vst [vmem:[%s4929_s27 + $0xf8] sm:$0xff] %v3848_v50  ;;  %v3027_v16 = vadd.f32 %v3026_v36, %v2996_v13 }
 0x378   : > { %v2886_v5 = vpop.f32.mrf.mxu1 }
 0x379   : > { %2927 = vst [vmem:[%s4929_s27 + $0xe8] sm:$0xff] %v2886_v5  ;;  %v2958_v12 = vadd.f32 %v2957_v11, %v2886_v5  ;;  %v2997_v7 = vmul.f32 %v2886_v5, %v2886_v5 }
 0x37a   : > { %3943 = shalt.err (!%p3940_p3)
}
 0x37b   : > { %s3944_s17 = scalar_lea.hbm %s5025_s6, 4096  ;;  %s3948_s24 = scalar_lea.hbm %s5092_s2, 8192 }
 0x37c   : > { %p3945_p4 = scmp.ne.s32.totalorder %s5025_s6, %s3944_s17  ;;  %p3949_p9 = scmp.lt.s32.totalorder %s5025_s6, %s5092_s2 }
 0x37d   : > { %p3950_p10 = scmp.lt.s32.totalorder %s3948_s24, %s3944_s17 }
 0x37e   : > { %p3946_p7 = pnand %p3945_p4, %p4092_p5 }
 0x37f   : > { %p3951_p11 = por %p3950_p10, %p3949_p9 }
 0x380   : > { %p3947_p8 = pneg %p3946_p7 }
 0x382   : > { %p3952_p12 = pnand %p3951_p11, %p3947_p8 }
 0x384   : > { %3955 = shalt.err (!%p3952_p12)
}
 0x385   : > { %s4032_s28 = smov 128   ;;  %v2998_v31 = vmul.f32 %v3847_v4, %v3847_v4  ;;  %v2959_v28 = vadd.f32 %v3847_v4, %v2958_v12  ;;  %v3028_v17 = vadd.f32 %v3027_v16, %v2997_v7  ;;  %v2999_v40 = vmul.f32 %v3848_v50, %v3848_v50  ;;  %s3169_s4 = sshll.u32 %s4922_s25, 1 }
 0x386   : > { %3857 = dma.vmem_to_hbm [thread:$0]  (%p4092_p5), %s5028_s29, 4096, %s5025_s6, %s3039_s7, %s4032_s28, %s4032_s28, %s4024_s30  }
 0x387   : > { %v2960_v45 = vadd.f32 %v3848_v50, %v2959_v28  ;;  %v3029_v8 = vadd.f32 %v3028_v17, %v2998_v31  ;;  %s3499_s30 = sshll.u32 %s4075_s16, 5  ;;  %s174_s29 = scalar_lea.vmem [#allocation6], %s3169_s4 }
 0x388   : > { %s3073_s5 = sshll.u32 %s174_s29, 4  ;;  %s3071_s8 = scalar_lea.hbm %s5093_s3, %s3499_s30  ;;  %s3074_s5 = int_to_ptr.vmem [resolvable:$true] %s3073_s5 }
 0x389   : > { %v2961_v55 = vrot.slane %v2960_v45, 4  ;;  %v3030_v32 = vadd.f32 %v3029_v8, %v2999_v40  ;;  %s3044_s9 = scalar_lea.sflag [#allocation7], %s4922_s25  ;;  %s3956_s10 = scalar_lea.vmem %s3074_s5, 32 }
 0x38a   : > { %p3957_p13 = scmp.ne.s32.totalorder %s3074_s5, %s3956_s10  ;;  %s4033_s11 = smov [#allocation6]  }
 0x38b   : > { %v2962_v53 = vadd.f32 %v2961_v55, %v2960_v45  ;;  %v3031_v37 = vrot.slane %v3030_v32, 4  ;;  %s3960_s16 = sshll.u32 %s4033_s11, 4  ;;  %s3961_s16 = int_to_ptr.vmem [resolvable:$false] %s3960_s16 }
 0x38c   : > { %p3958_p0 = pnand %p3957_p13, %p4092_p5  ;;  %s3962_s17 = scalar_lea.vmem %s3961_s16, 64 }
 0x38d   : > { %v2963_v41 = vrot.slane %v2962_v53, 2  ;;  %v3032_v10 = vadd.f32 %v3031_v37, %v3030_v32  ;;  %p3963_p2 = scmp.lt.s32.totalorder %s3074_s5, %s3961_s16  ;;  %p3964_p3 = scmp.lt.s32.totalorder %s3962_s17, %s3956_s10 }
 0x38e   : > { %p3959_p1 = pneg %p3958_p0 }
 0x38f   : > { %v2964_v56 = vadd.f32 %v2963_v41, %v2962_v53  ;;  %v3033_v39 = vrot.slane %v3032_v10, 2  ;;  %p3965_p4 = por %p3964_p3, %p3963_p2 }
 0x391   : > { %v2965_v33 = vrot.slane %v2964_v56, 1  ;;  %v3034_v14 = vadd.f32 %v3033_v39, %v3032_v10  ;;  %p3966_p7 = pnand %p3965_p4, %p3959_p1 }
 0x393   : > { %v2966_v9 = vadd.f32 %v2965_v33, %v2964_v56  ;;  %v3035_v18 = vrot.slane %v3034_v14, 1 }
 0x395   : > { %2967 = vst [vmem:[%s174_s29] sm:$0x1] %v2966_v9  ;;  %v3036_v0 = vadd.f32 %v3035_v18, %v3034_v14 }
 0x397   : > { %3037 = vst [vmem:[%s174_s29 + $0x1] sm:$0x1] %v3036_v0 }
 0x398   : > { %3969 = shalt.err (!%p3966_p7)
}
 0x399   : > { %s3970_s19 = scalar_lea.hbm %s3071_s8, 32  ;;  %s3974_s24 = scalar_lea.hbm %s5093_s3, 64 }
 0x39a   : > { %p3971_p8 = scmp.ne.s32.totalorder %s3071_s8, %s3970_s19  ;;  %p3975_p11 = scmp.lt.s32.totalorder %s3071_s8, %s5093_s3 }
 0x39b   : > { %p3976_p12 = scmp.lt.s32.totalorder %s3974_s24, %s3970_s19 }
 0x39c   : > { %p3972_p9 = pnand %p3971_p8, %p4092_p5 }
 0x39d   : > { %p3977_p13 = por %p3976_p12, %p3975_p11 }
 0x39e   : > { %p3973_p10 = pneg %p3972_p9 }
 0x3a0   : > { %p3978_p0 = pnand %p3977_p13, %p3973_p10 }
 0x3a2   : > { %3981 = shalt.err (!%p3978_p0)
}
 0x3a3   : > { %3858 = dma.vmem_to_hbm [thread:$0]  (%p4092_p5), %s3074_s5, 32, %s3071_s8, %s3044_s9  }
 0x3a4 PF: > { %p3868_p1 = scmp.ge.s32.totalorder %s4020_s15, 2  ;;  %s3085_s28 = sand.u32 1, %s4008_s12  }
 0x3a5   : > { %s3086_s4 = scalar_lea.sflag [#allocation5], %s3085_s28 }
 0x3a6   : > { %p3862_p2 = pnand %p3868_p1, %p4096_p6 }
 0x3a8   : > { %p3863_p3 = pneg %p3862_p2 }
 0x3aa   : > { %3999 = dma.done.wait (%p3863_p3), %s3086_s4, 4096  }
 0x3ab   : > { %4001 = vsyncadd (%p3863_p3), %s3086_s4, 4294963200  ;;  %s3095_s30 = scalar_lea.sflag [#allocation7], %s3085_s28 }
 0x3ac   : > { %4003 = dma.done.wait (%p3863_p3), %s3095_s30, 32  }
 0x3ad   : > { %4005 = vsyncadd (%p3863_p3), %s3095_s30, 4294967264  ;;  %p17_p5 = scmp.ge.s32.totalorder %s4079_s18, 4   ;;  %s5096_s12 = smov %s4012_s13 }
 0x3ae   : > { %s5097_s13 = smov %s4016_s14  ;;  %s5098_s14 = smov %s4090_s21 }
 0x3af   : > { %s5099_s15 = smov %s4079_s18  ;;  %19 = sbr.rel (!%p17_p5) target bundleno = 5 (0x5), region = 82 }
 0x3b4   :  { %3100 = vsyncpa [#allocation5], 1 }
 0x3b5   :  { %3102 = vsyncpa [#allocation5 + $0x1], 1 }
 0x3b6   :  { %3103 = vsyncpa [#allocation7], 1 }
 0x3b7   :  { %3105 = vsyncpa [#allocation7 + $0x1], 1 }

</bundles_post_ra>
